<compile_context>
chip_gen: v6e
topology: v6e:2x2x1
jax: 0.10.0
libtpu: 0.0.40
codegen_flags: <defaults>
</compile_context>

<pallas_src>
import math

import jax
import jax.numpy as jnp
from jax.experimental import pallas as pl
from jax.experimental.pallas import tpu as pltpu

NUM_CHUNKS = 16   # RangeBN default num_chunks
EPS = 1e-5        # RangeBN default eps
_PAD_COL = 8      # sublane-aligned column offset of the data inside the halo scratch


# ---------------------------------------------------------------------------
# 3x3 convolution (stride=1, padding=1, no bias): one MXU matmul per batch elt.
# Optionally fuses "y = relu(x * a + b)" (folded RangeBN) onto its own input.
# ---------------------------------------------------------------------------
def _conv3x3_body(xin, w_ref, o_ref, xpad_ref):
    # xin: (H, W, Cin) f32 (already normalized if fused); w_ref: (9*Cin, Cout)
    h, w, cin = xin.shape

    # Build the padded plane in VMEM scratch (removes the HBM pad round trip).
    xpad_ref[...] = jnp.zeros(xpad_ref.shape, jnp.float32)
    xpad_ref[1:h + 1, _PAD_COL:_PAD_COL + w, :] = xin

    # im2col: concatenate the 9 taps along the channel (lane) axis so the conv
    # is a single large-K matmul (K = 9*Cin) instead of nine K=Cin matmuls.
    taps = []
    for kh in range(3):
        for kw in range(3):
            c0 = _PAD_COL - 1 + kw
            taps.append(xpad_ref[kh:kh + h, c0:c0 + w, :])
    patches = jnp.concatenate(taps, axis=-1).reshape(h * w, 9 * cin)

    acc = jnp.dot(patches, w_ref[...].astype(jnp.float32),
                  preferred_element_type=jnp.float32)
    # TODO(synk): for small Cout the store is lane-sparse; a channel-packed
    # output layout (Cout folded with W onto 128 lanes) would make it dense.
    o_ref[0] = acc.astype(o_ref.dtype)


def conv3x3_kernel(x_ref, w_ref, o_ref, xpad_ref):
    _conv3x3_body(x_ref[0].astype(jnp.float32), w_ref, o_ref, xpad_ref)


def bnrelu_conv3x3_kernel(x_ref, a_ref, b_ref, w_ref, o_ref, xpad_ref):
    # Fused bn1 + ReLU on the conv input (single FMA + max, in VMEM).
    xin = x_ref[0].astype(jnp.float32)
    xin = jnp.maximum(xin * a_ref[0] + b_ref[0], 0.0)
    _conv3x3_body(xin, w_ref, o_ref, xpad_ref)


def conv3x3_pallas(x_nhwc, w_mat, pre_scale=None, pre_shift=None):
    """3x3 conv, stride=1, pad=1.  w_mat: (9*Cin, Cout), taps (kh,kw,cin)-major."""
    b, h, w, cin = x_nhwc.shape
    assert w_mat.shape[0] == 9 * cin
    cout = w_mat.shape[1]

    x_spec = pl.BlockSpec((1, h, w, cin), lambda i: (i, 0, 0, 0))
    w_spec = pl.BlockSpec((9 * cin, cout), lambda i: (0, 0))
    o_spec = pl.BlockSpec((1, h * w, cout), lambda i: (i, 0, 0))
    vec_spec = pl.BlockSpec((1, cin), lambda i: (0, 0))

    if pre_scale is None:
        kernel = conv3x3_kernel
        args = (x_nhwc, w_mat)
        in_specs = [x_spec, w_spec]
    else:
        kernel = bnrelu_conv3x3_kernel
        args = (x_nhwc, pre_scale, pre_shift, w_mat)
        in_specs = [x_spec, vec_spec, vec_spec, w_spec]

    # TODO(synk): for production shapes, grid over (B, H-tiles) with halo rows
    # and block Cout so the f32 accumulator stays in a VMEM scratch.
    return pl.pallas_call(
        kernel,
        out_shape=jax.ShapeDtypeStruct((b, h * w, cout), jnp.float32),
        grid=(b,),
        in_specs=in_specs,
        out_specs=o_spec,
        scratch_shapes=[pltpu.VMEM((h + 2, w + 2 * _PAD_COL, cin), jnp.float32)],
        compiler_params=pltpu.CompilerParams(dimension_semantics=("parallel",)),
    )(*args)


# ---------------------------------------------------------------------------
# RangeBN statistics pass: gridded over chunks, emits folded affine (a, b).
# ---------------------------------------------------------------------------
def rangebn_stats(x2d, weight, bias):
    """Training-mode RangeBN stats.  Returns a = scale*w and b = bias - mean*a
    (each (1, C) f32) so the normalization downstream is one fused FMA."""
    n, c = x2d.shape
    assert n % NUM_CHUNKS == 0, (
        "RangeBN requires B*H*W divisible by num_chunks (=16), got %d" % n)
    chunk = n // NUM_CHUNKS
    scale_fix = ((0.5 * 0.35) * (1.0 + (math.pi * math.log(4.0)) ** 0.5)
                 / ((2.0 * math.log(float(chunk))) ** 0.5))

    def kernel(x_ref, w_ref, b_ref, a_out, b_out, sum_acc, max_acc, min_acc):
        i = pl.program_id(0)

        @pl.when(i == 0)
        def _():
            sum_acc[...] = jnp.zeros_like(sum_acc)
            max_acc[...] = jnp.zeros_like(max_acc)
            min_acc[...] = jnp.zeros_like(min_acc)

        xc = x_ref[...].astype(jnp.float32)                  # (chunk, C)
        sum_acc[...] += jnp.sum(xc, axis=0, keepdims=True)
        max_acc[...] += jnp.max(xc, axis=0, keepdims=True)   # sum of per-chunk maxima
        min_acc[...] += jnp.min(xc, axis=0, keepdims=True)   # sum of per-chunk minima

        @pl.when(i == pl.num_programs(0) - 1)
        def _():
            mean = sum_acc[...] * (1.0 / n)
            mean_max = max_acc[...] * (1.0 / NUM_CHUNKS)
            mean_min = min_acc[...] * (1.0 / NUM_CHUNKS)
            scale = pl.reciprocal(
                (mean_max - mean_min) * scale_fix + EPS, approx=True)
            a = scale * w_ref[...].astype(jnp.float32)
            a_out[...] = a
            b_out[...] = b_ref[...].astype(jnp.float32) - mean * a

    row = pl.BlockSpec((1, c), lambda i: (0, 0))
    return pl.pallas_call(
        kernel,
        out_shape=(jax.ShapeDtypeStruct((1, c), jnp.float32),
                   jax.ShapeDtypeStruct((1, c), jnp.float32)),
        grid=(NUM_CHUNKS,),
        in_specs=[pl.BlockSpec((chunk, c), lambda i: (i, 0)), row, row],
        out_specs=(row, row),
        scratch_shapes=[pltpu.VMEM((1, c), jnp.float32),
                        pltpu.VMEM((1, c), jnp.float32),
                        pltpu.VMEM((1, c), jnp.float32)],
        compiler_params=pltpu.CompilerParams(dimension_semantics=("arbitrary",)),
    )(x2d, weight, bias)


# ---------------------------------------------------------------------------
# Folded-BN apply + residual add + ReLU on a lane-dense 2-D view, tiled by rows.
# ---------------------------------------------------------------------------
def bn_apply_add_relu_kernel(x_ref, res_ref, a_ref, b_ref, o_ref):
    y = x_ref[...].astype(jnp.float32) * a_ref[...] + b_ref[...]
    y = y + res_ref[...].astype(jnp.float32)
    o_ref[...] = jnp.maximum(y, 0.0).astype(o_ref.dtype)


def bn_apply_add_relu(x2d, res2d, a_row, b_row, out_dtype):
    r, l = x2d.shape
    tr = r
    if r > 512:                         # tile rows so huge tensors never sit in VMEM
        for cand in (512, 256, 128, 64, 32, 16, 8):
            if r % cand == 0:
                tr = cand
                break
    row = pl.BlockSpec((1, l), lambda i: (0, 0))
    tile = pl.BlockSpec((tr, l), lambda i: (i, 0))
    return pl.pallas_call(
        bn_apply_add_relu_kernel,
        out_shape=jax.ShapeDtypeStruct((r, l), out_dtype),
        grid=(r // tr,),
        in_specs=[tile, tile, row, row],
        out_specs=tile,
        compiler_params=pltpu.CompilerParams(dimension_semantics=("parallel",)),
    )(x2d, res2d, a_row, b_row)


def _fold_lanes(flat, c):
    """(N, C) -> (N*C/128, 128) lane-dense view when channels pack into 128 lanes."""
    n = flat.shape[0]
    if c < 128 and 128 % c == 0 and (n * c) % 128 == 0:
        rep = 128 // c
        return flat.reshape(n * c // 128, 128), rep
    return flat, 1


# ---------------------------------------------------------------------------
# BasicBlock forward (stride=1, downsample=None)
# ---------------------------------------------------------------------------
def basic_block_forward(x_nchw, params):
    b, cin, h, w = x_nchw.shape
    planes = params["conv1_w"].shape[1]
    assert cin == planes, "downsample=None requires inplanes == planes (stride=1)"

    x = jnp.transpose(x_nchw, (0, 2, 3, 1))                      # NHWC

    out1 = conv3x3_pallas(x, params["conv1_w"])                  # (B, H*W, planes)
    a1, b1 = rangebn_stats(out1.reshape(b * h * w, planes),
                           params["bn1_w"], params["bn1_b"])     # bn1 (folded)

    # conv2 with bn1 + ReLU fused onto its input (normalized act never hits HBM)
    out2 = conv3x3_pallas(out1.reshape(b, h, w, planes), params["conv2_w"],
                          pre_scale=a1, pre_shift=b1)            # (B, H*W, planes)
    a2, b2 = rangebn_stats(out2.reshape(b * h * w, planes),
                           params["bn2_w"], params["bn2_b"])     # bn2 (folded)

    # bn2 apply + residual + ReLU on a lane-dense folded view.
    x2d, rep = _fold_lanes(out2.reshape(b * h * w, planes), planes)
    res2d, _ = _fold_lanes(x.reshape(b * h * w, planes), planes)
    y = bn_apply_add_relu(x2d, res2d,
                          jnp.tile(a2, (1, rep)), jnp.tile(b2, (1, rep)),
                          x_nchw.dtype)

    y = y.reshape(b, h, w, planes)
    return jnp.transpose(y, (0, 3, 1, 2))                        # back to NCHW


def init_params(key, inplanes, planes):
    k1, k2, k3 = jax.random.split(key, 3)
    # PyTorch conv weight (Cout, Cin, 3, 3) -> (kh, kw, Cin, Cout) -> (9*Cin, Cout)
    w1 = jax.random.normal(k1, (planes, inplanes, 3, 3), jnp.float32) \
        * math.sqrt(2.0 / (inplanes * 9))
    w2 = jax.random.normal(k2, (planes, planes, 3, 3), jnp.float32) \
        * math.sqrt(2.0 / (planes * 9))

    def to_mat(wt):
        cout, cin = wt.shape[0], wt.shape[1]
        return jnp.transpose(wt, (2, 3, 1, 0)).reshape(9 * cin, cout)

    return {
        "conv1_w": to_mat(w1),
        "conv2_w": to_mat(w2),
        "bn1_w": jax.random.uniform(k3, (1, planes), jnp.float32),
        "bn1_b": jnp.zeros((1, planes), jnp.float32),
        "bn2_w": jnp.ones((1, planes), jnp.float32),
        "bn2_b": jnp.zeros((1, planes), jnp.float32),
    }


if __name__ == "__main__":
    key = jax.random.PRNGKey(0)
    kx, kp = jax.random.split(key)

    B, C, H, W = 2, 4, 16, 16          # inplanes = planes = 4, stride = 1
    x = jax.random.normal(kx, (B, C, H, W), jnp.float32)
    params = init_params(kp, inplanes=C, planes=C)

    out = basic_block_forward(x, params)
    out = jax.block_until_ready(out)

    assert out.shape == (B, C, H, W)
    assert bool(jnp.all(out >= 0.0))   # final ReLU
    print("KERNEL_OK")
</pallas_src>

<mosaic_0001>
module attributes {stable_mosaic.version = 11 : i64} {
  func.func @conv3x3_kernel(%arg0: i32, %arg1: memref<1x16x16x4xf32, #tpu.memory_space<vmem>>, %arg2: memref<36x4xf32, #tpu.memory_space<vmem>>, %arg3: memref<1x256x4xf32, #tpu.memory_space<vmem>>, %arg4: memref<18x32x4xf32, #tpu.memory_space<vmem>>) attributes {dimension_semantics = [#tpu.dimension_semantics<parallel>], iteration_bounds = array<i64: 2>, scalar_prefetch = 0 : i64, scratch_operands = 1 : i64, tpu.core_type = #tpu.core_type<tc>, window_params = [{transform_indices = @transform_0, window_bounds = array<i64: 1, 16, 16, 4>}, {pipeline_mode = #tpu.pipeline_mode<synchronous>, transform_indices = @transform_1, window_bounds = array<i64: 36, 4>}, {transform_indices = @transform_2, window_bounds = array<i64: 1, 256, 4>}]} {
    %c0 = arith.constant 0 : index
    %c0_0 = arith.constant 0 : index
    %c0_1 = arith.constant 0 : index
    %c0_2 = arith.constant 0 : index
    %0 = vector.load %arg1[%c0, %c0_0, %c0_1, %c0_2] : memref<1x16x16x4xf32, #tpu.memory_space<vmem>>, vector<1x16x16x4xf32>
    %1 = vector.shape_cast %0 : vector<1x16x16x4xf32> to vector<16x16x4xf32>
    %cst = arith.constant 0.000000e+00 : f32
    %2 = vector.broadcast %cst : f32 to vector<18x32x4xf32>
    %c0_3 = arith.constant 0 : index
    %c0_4 = arith.constant 0 : index
    %c0_5 = arith.constant 0 : index
    %3 = vector.load %arg4[%c0_3, %c0_4, %c0_5] : memref<18x32x4xf32, #tpu.memory_space<vmem>>, vector<18x32x4xf32>
    tpu.vector_store %arg4[%c0_3, %c0_4, %c0_5], %2 {strides = array<i32>} : memref<18x32x4xf32, #tpu.memory_space<vmem>>, vector<18x32x4xf32>,
    %c1 = arith.constant 1 : index
    %c8 = arith.constant 8 : index
    %c0_6 = arith.constant 0 : index
    %4 = vector.load %arg4[%c1, %c8, %c0_6] : memref<18x32x4xf32, #tpu.memory_space<vmem>>, vector<16x16x4xf32>
    tpu.vector_store %arg4[%c1, %c8, %c0_6], %1 {strides = array<i32>} : memref<18x32x4xf32, #tpu.memory_space<vmem>>, vector<16x16x4xf32>,
    %c0_7 = arith.constant 0 : index
    %c7 = arith.constant 7 : index
    %c0_8 = arith.constant 0 : index
    %5 = vector.load %arg4[%c0_7, %c7, %c0_8] : memref<18x32x4xf32, #tpu.memory_space<vmem>>, vector<16x16x4xf32>
    %c0_9 = arith.constant 0 : index
    %c8_10 = arith.constant 8 : index
    %c0_11 = arith.constant 0 : index
    %6 = vector.load %arg4[%c0_9, %c8_10, %c0_11] : memref<18x32x4xf32, #tpu.memory_space<vmem>>, vector<16x16x4xf32>
    %c0_12 = arith.constant 0 : index
    %c9 = arith.constant 9 : index
    %c0_13 = arith.constant 0 : index
    %7 = vector.load %arg4[%c0_12, %c9, %c0_13] : memref<18x32x4xf32, #tpu.memory_space<vmem>>, vector<16x16x4xf32>
    %c1_14 = arith.constant 1 : index
    %c7_15 = arith.constant 7 : index
    %c0_16 = arith.constant 0 : index
    %8 = vector.load %arg4[%c1_14, %c7_15, %c0_16] : memref<18x32x4xf32, #tpu.memory_space<vmem>>, vector<16x16x4xf32>
    %c1_17 = arith.constant 1 : index
    %c8_18 = arith.constant 8 : index
    %c0_19 = arith.constant 0 : index
    %9 = vector.load %arg4[%c1_17, %c8_18, %c0_19] : memref<18x32x4xf32, #tpu.memory_space<vmem>>, vector<16x16x4xf32>
    %c1_20 = arith.constant 1 : index
    %c9_21 = arith.constant 9 : index
    %c0_22 = arith.constant 0 : index
    %10 = vector.load %arg4[%c1_20, %c9_21, %c0_22] : memref<18x32x4xf32, #tpu.memory_space<vmem>>, vector<16x16x4xf32>
    %c2 = arith.constant 2 : index
    %c7_23 = arith.constant 7 : index
    %c0_24 = arith.constant 0 : index
    %11 = vector.load %arg4[%c2, %c7_23, %c0_24] : memref<18x32x4xf32, #tpu.memory_space<vmem>>, vector<16x16x4xf32>
    %c2_25 = arith.constant 2 : index
    %c8_26 = arith.constant 8 : index
    %c0_27 = arith.constant 0 : index
    %12 = vector.load %arg4[%c2_25, %c8_26, %c0_27] : memref<18x32x4xf32, #tpu.memory_space<vmem>>, vector<16x16x4xf32>
    %c2_28 = arith.constant 2 : index
    %c9_29 = arith.constant 9 : index
    %c0_30 = arith.constant 0 : index
    %13 = vector.load %arg4[%c2_28, %c9_29, %c0_30] : memref<18x32x4xf32, #tpu.memory_space<vmem>>, vector<16x16x4xf32>
    %14 = tpu.concatenate %5, %6, %7, %8, %9, %10, %11, %12, %13 in 2 : vector<16x16x4xf32>, vector<16x16x4xf32>, vector<16x16x4xf32>, vector<16x16x4xf32>, vector<16x16x4xf32>, vector<16x16x4xf32>, vector<16x16x4xf32>, vector<16x16x4xf32>, vector<16x16x4xf32> -> vector<16x16x36xf32>
    %15 = vector.shape_cast %14 : vector<16x16x36xf32> to vector<256x36xf32>
    %c0_31 = arith.constant 0 : index
    %c0_32 = arith.constant 0 : index
    %16 = vector.load %arg2[%c0_31, %c0_32] : memref<36x4xf32, #tpu.memory_space<vmem>>, vector<36x4xf32>
    %cst_33 = arith.constant dense<0.000000e+00> : vector<256x4xf32>
    %17 = tpu.matmul %15, %16, %cst_33 {dimension_numbers = #tpu.dot_dimension_numbers<[1], [0], [0], [1], [0, 0, 1, 1], [], []>} : vector<256x36xf32>, vector<36x4xf32>, vector<256x4xf32> -> vector<256x4xf32>
    %c0_34 = arith.constant 0 : index
    %c0_35 = arith.constant 0 : index
    %c0_36 = arith.constant 0 : index
    %18 = vector.load %arg3[%c0_34, %c0_35, %c0_36] : memref<1x256x4xf32, #tpu.memory_space<vmem>>, vector<1x256x4xf32>
    %19 = vector.shape_cast %18 : vector<1x256x4xf32> to vector<256x4xf32>
    %20 = vector.shape_cast %17 : vector<256x4xf32> to vector<1x256x4xf32>
    tpu.vector_store %arg3[%c0_34, %c0_35, %c0_36], %20 {strides = array<i32>} : memref<1x256x4xf32, #tpu.memory_space<vmem>>, vector<1x256x4xf32>,
    return
  }
  func.func @transform_0(%arg0: i32) -> (i32, i32, i32, i32) {
    %c0_i32 = arith.constant 0 : i32
    %c0_i32_0 = arith.constant 0 : i32
    %c0_i32_1 = arith.constant 0 : i32
    %c0_i32_2 = arith.constant 0 : i32
    return %arg0, %c0_i32, %c0_i32_0, %c0_i32_1 : i32, i32, i32, i32
  }
  func.func @transform_1(%arg0: i32) -> (i32, i32) {
    %c0_i32 = arith.constant 0 : i32
    %c0_i32_0 = arith.constant 0 : i32
    %c0_i32_1 = arith.constant 0 : i32
    return %c0_i32, %c0_i32_0 : i32, i32
  }
  func.func @transform_2(%arg0: i32) -> (i32, i32, i32) {
    %c0_i32 = arith.constant 0 : i32
    %c0_i32_0 = arith.constant 0 : i32
    %c0_i32_1 = arith.constant 0 : i32
    return %arg0, %c0_i32, %c0_i32_0 : i32, i32, i32
  }
}

</mosaic_0001>

<bundles_post_ra>
// kernel: tpu_custom_call.1
= control target key start
LH: loop header
LB: loop body
LE: loop exit
PB: predicated region body
PF: predicated region fallthrough
CT: control target
= control target key end

     0   :  { %s2496_s9 = smov 0   ;;  %s4061_s0 = inlined_call_operand.vmem [shape: f32[2,16,16,4], index: 0, kind: input, shape index: {}]   ;;  %s4062_s1 = inlined_call_operand.vmem [shape: f32[36,4], index: 1, kind: input, shape index: {}]   ;;  %s4063_s2 = inlined_call_operand.vmem [shape: f32[2,256,4], index: 2, kind: output, shape index: {}]  }
   0x1 LB: > { %s2276_s10 = sadd.s32 4294967295, %s2470_s9   ;;  %p2280_p0 = scmp.ge.s32.totalorder %s2470_s9, 1  ;;  %s2470_s9 = sphi %s2496_s9, %s12_s9  }
   0x2   : > { %p112_p1 = scmp.lt.s32.totalorder %s2470_s9, 3 }
   0x4   : > { %p113_p2 = pnand %p2280_p0, %p112_p1 }
   0x6   : > { %116 = sbr.rel (%p113_p2) target bundleno = 876 (0x36c), region = 28 }
   0xb   : > { %vm176_vm0 = vcmask 31744   ;;  %p2506_p3 = scmp.lt.s32.totalorder %s2276_s10, 1  ;;  %v2472_v0 = vmov 0.0   ;;  %s2473_s16 = smov 4   ;;  %vm1960_vm1 = vcmask 1043456   ;;  %vm1627_vm2 = vcmask 64512  }
   0xc   : > { %178 = vst.msk [vmem:[#allocation2 + $0x8] sm:$0xff] %vm176_vm0, %v2472_v0  ;;  %177 = vst.msk [vmem:[#allocation2] sm:$0xff] %vm176_vm0, %v2472_v0  ;;  %s2474_s17 = smov 8   ;;  %s2475_s18 = smov 12   ;;  %vm1660_vm3 = vcmask 97280   ;;  %vm1693_vm4 = vcmask 130048  }
   0xd   : > { %179 = vst.msk [vmem:[#allocation2 + $0x10] sm:$0xff] %vm176_vm0, %v2472_v0  ;;  %180 = vst.msk [vmem:[#allocation2 + $0x18] sm:$0xff] %vm176_vm0, %v2472_v0  ;;  %s4238_s10 = smov (!%p2506_p3, %s2276_s10), 1  ;;  %s2476_s19 = smov 16   ;;  %vm1726_vm5 = vcmask 162816   ;;  %vm1759_vm6 = vcmask 195584  }
   0xe   : > { %181 = vst.msk [vmem:[#allocation2 + $0x20] sm:$0xff] %vm176_vm0, %v2472_v0  ;;  %182 = vst.msk [vmem:[#allocation2 + $0x28] sm:$0xff] %vm176_vm0, %v2472_v0  ;;  %s2320_s12 = sshll.u32 %s4238_s10, 8  ;;  %s2477_s20 = smov 20   ;;  %vm1825_vm7 = vcmask 261120   ;;  %vm1792_vm8 = vcmask 228352  }
   0xf   : > { %183 = vst.msk [vmem:[#allocation2 + $0x30] sm:$0xff] %vm176_vm0, %v2472_v0  ;;  %184 = vst.msk [vmem:[#allocation2 + $0x38] sm:$0xff] %vm176_vm0, %v2472_v0  ;;  %s2666_s15 = scalar_lea.vmem %s4061_s0, %s2320_s12  ;;  %s2478_s21 = smov 24   ;;  %vm1863_vm9 = vcmask 293888  }
  0x10   : > { %185 = vst.msk [vmem:[#allocation2 + $0x40] sm:$0xff] %vm176_vm0, %v2472_v0  ;;  %186 = vst.msk [vmem:[#allocation2 + $0x48] sm:$0xff] %vm176_vm0, %v2472_v0  ;;  %v144_v1 = vld [vmem:[%s2666_s15] sm:$0xff]  ;;  %v146_v2 = vld [vmem:[%s2666_s15 + $0x10] sm:$0xff]  ;;  %s2479_s26 = smov 28   ;;  %s2480_s5 = smov 32  }
  0x11   : > { %187 = vst.msk [vmem:[#allocation2 + $0x50] sm:$0xff] %vm176_vm0, %v2472_v0  ;;  %188 = vst.msk [vmem:[#allocation2 + $0x58] sm:$0xff] %vm176_vm0, %v2472_v0  ;;  %v145_v3 = vld [vmem:[%s2666_s15 + $0x8] sm:$0xff]  ;;  %v148_v4 = vld [vmem:[%s2666_s15 + $0x20] sm:$0xff]  ;;  %s3884_s8 = scalar_lea.vmem %s4063_s2, %s2320_s12 }
  0x12   : > { %189 = vst.msk [vmem:[#allocation2 + $0x60] sm:$0xff] %vm176_vm0, %v2472_v0  ;;  %190 = vst.msk [vmem:[#allocation2 + $0x68] sm:$0xff] %vm176_vm0, %v2472_v0  ;;  %v147_v5 = vld [vmem:[%s2666_s15 + $0x18] sm:$0xff]  ;;  %v150_v6 = vld [vmem:[%s2666_s15 + $0x30] sm:$0xff] }
  0x13   : > { %191 = vst.msk [vmem:[#allocation2 + $0x70] sm:$0xff] %vm176_vm0, %v2472_v0  ;;  %192 = vst.msk [vmem:[#allocation2 + $0x78] sm:$0xff] %vm176_vm0, %v2472_v0  ;;  %v314_v7 = vld [vmem:[#allocation2 + $0x8] sm:$0xff]  ;;  %v152_v10 = vld [vmem:[%s2666_s15 + $0x40] sm:$0xff] }
  0x14   : > { %193 = vst.msk [vmem:[#allocation2 + $0x80] sm:$0xff] %vm176_vm0, %v2472_v0  ;;  %194 = vst.msk [vmem:[#allocation2 + $0x88] sm:$0xff] %vm176_vm0, %v2472_v0  ;;  %v315_v8 = vld [vmem:[#allocation2 + $0x10] sm:$0xff]  ;;  %v149_v9 = vld [vmem:[%s2666_s15 + $0x28] sm:$0xff]  ;;  %603 = vrot.lane.b32.xlu0 %v314_v7, %s2473_s16 }
  0x15   : > { %195 = vst.msk [vmem:[#allocation2 + $0x90] sm:$0xff] %vm176_vm0, %v2472_v0  ;;  %196 = vst.msk [vmem:[#allocation2 + $0x98] sm:$0xff] %vm176_vm0, %v2472_v0  ;;  %v151_v11 = vld [vmem:[%s2666_s15 + $0x38] sm:$0xff]  ;;  %v154_v12 = vld [vmem:[%s2666_s15 + $0x50] sm:$0xff] }
  0x16   : > { %197 = vst.msk [vmem:[#allocation2 + $0xa0] sm:$0xff] %vm176_vm0, %v2472_v0  ;;  %198 = vst.msk [vmem:[#allocation2 + $0xa8] sm:$0xff] %vm176_vm0, %v2472_v0  ;;  %v153_v13 = vld [vmem:[%s2666_s15 + $0x48] sm:$0xff]  ;;  %v156_v14 = vld [vmem:[%s2666_s15 + $0x60] sm:$0xff] }
  0x17   : > { %199 = vst.msk [vmem:[#allocation2 + $0xb0] sm:$0xff] %vm176_vm0, %v2472_v0  ;;  %200 = vst.msk [vmem:[#allocation2 + $0xb8] sm:$0xff] %vm176_vm0, %v2472_v0  ;;  %v155_v15 = vld [vmem:[%s2666_s15 + $0x58] sm:$0xff]  ;;  %v158_v16 = vld [vmem:[%s2666_s15 + $0x70] sm:$0xff] }
  0x18   : > { %201 = vst.msk [vmem:[#allocation2 + $0xc0] sm:$0xff] %vm176_vm0, %v2472_v0  ;;  %202 = vst.msk [vmem:[#allocation2 + $0xc8] sm:$0xff] %vm176_vm0, %v2472_v0  ;;  %v157_v17 = vld [vmem:[%s2666_s15 + $0x68] sm:$0xff]  ;;  %v160_v18 = vld [vmem:[%s2666_s15 + $0x80] sm:$0xff]  ;;  %605 = vrot.lane.b32.xlu0 %v315_v8, %s2473_s16 }
  0x19   : > { %203 = vst.msk [vmem:[#allocation2 + $0xd0] sm:$0xff] %vm176_vm0, %v2472_v0  ;;  %204 = vst.msk [vmem:[#allocation2 + $0xd8] sm:$0xff] %vm176_vm0, %v2472_v0  ;;  %v159_v19 = vld [vmem:[%s2666_s15 + $0x78] sm:$0xff]  ;;  %v162_v20 = vld [vmem:[%s2666_s15 + $0x90] sm:$0xff] }
  0x1a   : > { %205 = vst.msk [vmem:[#allocation2 + $0xe0] sm:$0xff] %vm176_vm0, %v2472_v0  ;;  %206 = vst.msk [vmem:[#allocation2 + $0xe8] sm:$0xff] %vm176_vm0, %v2472_v0  ;;  %v161_v21 = vld [vmem:[%s2666_s15 + $0x88] sm:$0xff]  ;;  %v164_v22 = vld [vmem:[%s2666_s15 + $0xa0] sm:$0xff] }
  0x1b   : > { %207 = vst.msk [vmem:[#allocation2 + $0xf0] sm:$0xff] %vm176_vm0, %v2472_v0  ;;  %208 = vst.msk [vmem:[#allocation2 + $0xf8] sm:$0xff] %vm176_vm0, %v2472_v0  ;;  %v163_v23 = vld [vmem:[%s2666_s15 + $0x98] sm:$0xff]  ;;  %v166_v24 = vld [vmem:[%s2666_s15 + $0xb0] sm:$0xff] }
  0x1c   : > { %209 = vst.msk [vmem:[#allocation2 + $0x100] sm:$0xff] %vm176_vm0, %v2472_v0  ;;  %210 = vst.msk [vmem:[#allocation2 + $0x108] sm:$0xff] %vm176_vm0, %v2472_v0  ;;  %v165_v28 = vld [vmem:[%s2666_s15 + $0xa8] sm:$0xff]  ;;  %v168_v29 = vld [vmem:[%s2666_s15 + $0xc0] sm:$0xff] }
  0x1d   : > { %211 = vst.msk [vmem:[#allocation2 + $0x110] sm:$0xff] %vm176_vm0, %v2472_v0  ;;  %212 = vst.msk [vmem:[#allocation2 + $0x118] sm:$0xff] %vm176_vm0, %v2472_v0  ;;  %v167_v33 = vld [vmem:[%s2666_s15 + $0xb8] sm:$0xff]  ;;  %v170_v34 = vld [vmem:[%s2666_s15 + $0xd0] sm:$0xff] }
  0x1e   : > { %213 = vst.msk [vmem:[#allocation2 + $0x120] sm:$0xff] %vm176_vm0, %v2472_v0  ;;  %214 = vst.msk [vmem:[#allocation2 + $0x128] sm:$0xff] %vm176_vm0, %v2472_v0  ;;  %v169_v35 = vld [vmem:[%s2666_s15 + $0xc8] sm:$0xff]  ;;  %v172_v36 = vld [vmem:[%s2666_s15 + $0xe0] sm:$0xff] }
  0x1f   : > { %215 = vst.msk [vmem:[#allocation2 + $0x130] sm:$0xff] %vm176_vm0, %v2472_v0  ;;  %216 = vst.msk [vmem:[#allocation2 + $0x138] sm:$0xff] %vm176_vm0, %v2472_v0  ;;  %v171_v37 = vld [vmem:[%s2666_s15 + $0xd8] sm:$0xff]  ;;  %v173_v39 = vld [vmem:[%s2666_s15 + $0xe8] sm:$0xff] }
  0x20   : > { %217 = vst.msk [vmem:[#allocation2 + $0x140] sm:$0xff] %vm176_vm0, %v2472_v0  ;;  %218 = vst.msk [vmem:[#allocation2 + $0x148] sm:$0xff] %vm176_vm0, %v2472_v0  ;;  %v174_v58 = vld [vmem:[%s2666_s15 + $0xf0] sm:$0xff]  ;;  %v175_v62 = vld [vmem:[%s2666_s15 + $0xf8] sm:$0xff] }
  0x21   : > { %219 = vst.msk [vmem:[#allocation2 + $0x150] sm:$0xff] %vm176_vm0, %v2472_v0  ;;  %220 = vst.msk [vmem:[#allocation2 + $0x158] sm:$0xff] %vm176_vm0, %v2472_v0 }
  0x22   : > { %221 = vst.msk [vmem:[#allocation2 + $0x160] sm:$0xff] %vm176_vm0, %v2472_v0  ;;  %222 = vst.msk [vmem:[#allocation2 + $0x168] sm:$0xff] %vm176_vm0, %v2472_v0 }
  0x23   : > { %223 = vst.msk [vmem:[#allocation2 + $0x170] sm:$0xff] %vm176_vm0, %v2472_v0  ;;  %224 = vst.msk [vmem:[#allocation2 + $0x178] sm:$0xff] %vm176_vm0, %v2472_v0 }
  0x24   : > { %225 = vst.msk [vmem:[#allocation2 + $0x180] sm:$0xff] %vm176_vm0, %v2472_v0  ;;  %226 = vst.msk [vmem:[#allocation2 + $0x188] sm:$0xff] %vm176_vm0, %v2472_v0 }
  0x25   : > { %227 = vst.msk [vmem:[#allocation2 + $0x190] sm:$0xff] %vm176_vm0, %v2472_v0  ;;  %228 = vst.msk [vmem:[#allocation2 + $0x198] sm:$0xff] %vm176_vm0, %v2472_v0 }
  0x26   : > { %229 = vst.msk [vmem:[#allocation2 + $0x1a0] sm:$0xff] %vm176_vm0, %v2472_v0  ;;  %230 = vst.msk [vmem:[#allocation2 + $0x1a8] sm:$0xff] %vm176_vm0, %v2472_v0 }
  0x27   : > { %231 = vst.msk [vmem:[#allocation2 + $0x1b0] sm:$0xff] %vm176_vm0, %v2472_v0  ;;  %232 = vst.msk [vmem:[#allocation2 + $0x1b8] sm:$0xff] %vm176_vm0, %v2472_v0 }
  0x28   : > { %233 = vst.msk [vmem:[#allocation2 + $0x1c0] sm:$0xff] %vm176_vm0, %v2472_v0  ;;  %234 = vst.msk [vmem:[#allocation2 + $0x1c8] sm:$0xff] %vm176_vm0, %v2472_v0 }
  0x29   : > { %235 = vst.msk [vmem:[#allocation2 + $0x1d0] sm:$0xff] %vm176_vm0, %v2472_v0  ;;  %236 = vst.msk [vmem:[#allocation2 + $0x1d8] sm:$0xff] %vm176_vm0, %v2472_v0 }
  0x2a   : > { %237 = vst.msk [vmem:[#allocation2 + $0x1e0] sm:$0xff] %vm176_vm0, %v2472_v0  ;;  %238 = vst.msk [vmem:[#allocation2 + $0x1e8] sm:$0xff] %vm176_vm0, %v2472_v0 }
  0x2b   : > { %239 = vst.msk [vmem:[#allocation2 + $0x1f0] sm:$0xff] %vm176_vm0, %v2472_v0  ;;  %240 = vst.msk [vmem:[#allocation2 + $0x1f8] sm:$0xff] %vm176_vm0, %v2472_v0 }
  0x2c   : > { %241 = vst.msk [vmem:[#allocation2 + $0x200] sm:$0xff] %vm176_vm0, %v2472_v0  ;;  %242 = vst.msk [vmem:[#allocation2 + $0x208] sm:$0xff] %vm176_vm0, %v2472_v0 }
  0x2d   : > { %243 = vst.msk [vmem:[#allocation2 + $0x210] sm:$0xff] %vm176_vm0, %v2472_v0  ;;  %244 = vst.msk [vmem:[#allocation2 + $0x218] sm:$0xff] %vm176_vm0, %v2472_v0 }
  0x2e   : > { %245 = vst.msk [vmem:[#allocation2 + $0x220] sm:$0xff] %vm176_vm0, %v2472_v0  ;;  %246 = vst.msk [vmem:[#allocation2 + $0x228] sm:$0xff] %vm176_vm0, %v2472_v0 }
  0x2f   : > { %247 = vst.msk [vmem:[#allocation2 + $0x230] sm:$0xff] %vm176_vm0, %v2472_v0  ;;  %248 = vst.msk [vmem:[#allocation2 + $0x238] sm:$0xff] %vm176_vm0, %v2472_v0  ;;  %v346_v0 = vld [vmem:[#allocation2 + $0x9] sm:$0xff] }
  0x30   : > { %250 = vst.msk [vmem:[#allocation2 + $0x28] sm:$0xff] %vm176_vm0, %v144_v1  ;;  %252 = vst.msk [vmem:[#allocation2 + $0x48] sm:$0xff] %vm176_vm0, %v146_v2 }
  0x31   : > { %251 = vst.msk [vmem:[#allocation2 + $0x30] sm:$0xff] %vm176_vm0, %v145_v3  ;;  %254 = vst.msk [vmem:[#allocation2 + $0x68] sm:$0xff] %vm176_vm0, %v148_v4  ;;  %v347_v3 = vld [vmem:[#allocation2 + $0x11] sm:$0xff] }
  0x32   : > { %253 = vst.msk [vmem:[#allocation2 + $0x50] sm:$0xff] %vm176_vm0, %v147_v5  ;;  %256 = vst.msk [vmem:[#allocation2 + $0x88] sm:$0xff] %vm176_vm0, %v150_v6 }
  0x33   : > { %255 = vst.msk [vmem:[#allocation2 + $0x70] sm:$0xff] %vm176_vm0, %v149_v9  ;;  %258 = vst.msk [vmem:[#allocation2 + $0xa8] sm:$0xff] %vm176_vm0, %v152_v10 }
  0x34   : > { %257 = vst.msk [vmem:[#allocation2 + $0x90] sm:$0xff] %vm176_vm0, %v151_v11  ;;  %260 = vst.msk [vmem:[#allocation2 + $0xc8] sm:$0xff] %vm176_vm0, %v154_v12 }
  0x35   : > { %259 = vst.msk [vmem:[#allocation2 + $0xb0] sm:$0xff] %vm176_vm0, %v153_v13  ;;  %262 = vst.msk [vmem:[#allocation2 + $0xe8] sm:$0xff] %vm176_vm0, %v156_v14 }
  0x36   : > { %261 = vst.msk [vmem:[#allocation2 + $0xd0] sm:$0xff] %vm176_vm0, %v155_v15  ;;  %264 = vst.msk [vmem:[#allocation2 + $0x108] sm:$0xff] %vm176_vm0, %v158_v16 }
  0x37   : > { %263 = vst.msk [vmem:[#allocation2 + $0xf0] sm:$0xff] %vm176_vm0, %v157_v17  ;;  %266 = vst.msk [vmem:[#allocation2 + $0x128] sm:$0xff] %vm176_vm0, %v160_v18  ;;  %v2711_v25 = vld [vmem:[#allocation2 + $0x28] sm:$0xff] }
  0x38   : > { %265 = vst.msk [vmem:[#allocation2 + $0x110] sm:$0xff] %vm176_vm0, %v159_v19  ;;  %268 = vst.msk [vmem:[#allocation2 + $0x148] sm:$0xff] %vm176_vm0, %v162_v20  ;;  %v2713_v26 = vld [vmem:[#allocation2 + $0x48] sm:$0xff]  ;;  %607 = vrot.lane.b32.xlu1 %v2711_v25, %s2473_s16  ;;  %v2720_v27 = vld [vmem:[#allocation2 + $0x30] sm:$0xff] }
  0x39   : > { %267 = vst.msk [vmem:[#allocation2 + $0x130] sm:$0xff] %vm176_vm0, %v161_v21  ;;  %270 = vst.msk [vmem:[#allocation2 + $0x168] sm:$0xff] %vm176_vm0, %v164_v22  ;;  %611 = vrot.lane.b32.xlu0 %v2713_v26, %s2473_s16  ;;  %v2728_v30 = vld [vmem:[#allocation2 + $0x68] sm:$0xff]  ;;  %v2732_v31 = vld [vmem:[#allocation2 + $0x50] sm:$0xff] }
  0x3a   : > { %269 = vst.msk [vmem:[#allocation2 + $0x150] sm:$0xff] %vm176_vm0, %v163_v23  ;;  %272 = vst.msk [vmem:[#allocation2 + $0x188] sm:$0xff] %vm176_vm0, %v166_v24  ;;  %v2736_v32 = vld [vmem:[#allocation2 + $0x88] sm:$0xff]  ;;  %v2748_v38 = vld [vmem:[#allocation2 + $0x70] sm:$0xff] }
  0x3b   : > { %271 = vst.msk [vmem:[#allocation2 + $0x170] sm:$0xff] %vm176_vm0, %v165_v28  ;;  %274 = vst.msk [vmem:[#allocation2 + $0x1a8] sm:$0xff] %vm176_vm0, %v168_v29  ;;  %v2756_v40 = vld [vmem:[#allocation2 + $0xa8] sm:$0xff]  ;;  %v2760_v41 = vld [vmem:[#allocation2 + $0x90] sm:$0xff] }
  0x3c   : > { %609 = vrot.lane.b32.xlu1 %v2720_v27, %s2473_s16  ;;  %273 = vst.msk [vmem:[#allocation2 + $0x190] sm:$0xff] %vm176_vm0, %v167_v33  ;;  %276 = vst.msk [vmem:[#allocation2 + $0x1c8] sm:$0xff] %vm176_vm0, %v170_v34  ;;  %v2764_v42 = vld [vmem:[#allocation2 + $0xc8] sm:$0xff]  ;;  %v2768_v43 = vld [vmem:[#allocation2 + $0xb0] sm:$0xff] }
  0x3d   : > { %615 = vrot.lane.b32.xlu0 %v2728_v30, %s2473_s16  ;;  %275 = vst.msk [vmem:[#allocation2 + $0x1b0] sm:$0xff] %vm176_vm0, %v169_v35  ;;  %278 = vst.msk [vmem:[#allocation2 + $0x1e8] sm:$0xff] %vm176_vm0, %v172_v36  ;;  %v2772_v44 = vld [vmem:[#allocation2 + $0xe8] sm:$0xff]  ;;  %v2776_v45 = vld [vmem:[#allocation2 + $0xd0] sm:$0xff] }
  0x3e   : > { %277 = vst.msk [vmem:[#allocation2 + $0x1d0] sm:$0xff] %vm176_vm0, %v171_v37  ;;  %279 = vst.msk [vmem:[#allocation2 + $0x1f0] sm:$0xff] %vm176_vm0, %v173_v39  ;;  %v2780_v46 = vld [vmem:[#allocation2 + $0x108] sm:$0xff]  ;;  %v2784_v47 = vld [vmem:[#allocation2 + $0xf0] sm:$0xff] }
  0x3f   : > { %v2788_v48 = vld [vmem:[#allocation2 + $0x128] sm:$0xff]  ;;  %v2792_v49 = vld [vmem:[#allocation2 + $0x110] sm:$0xff]  ;;  %280 = vst.msk [vmem:[#allocation2 + $0x208] sm:$0xff] %vm176_vm0, %v174_v58  ;;  %281 = vst.msk [vmem:[#allocation2 + $0x210] sm:$0xff] %vm176_vm0, %v175_v62 }
  0x40   : > { %613 = vrot.lane.b32.xlu1 %v2732_v31, %s2473_s16  ;;  %v2796_v50 = vld [vmem:[#allocation2 + $0x148] sm:$0xff]  ;;  %v2800_v51 = vld [vmem:[#allocation2 + $0x130] sm:$0xff] }
  0x41   : > { %619 = vrot.lane.b32.xlu0 %v2736_v32, %s2473_s16  ;;  %v2804_v52 = vld [vmem:[#allocation2 + $0x168] sm:$0xff]  ;;  %v2808_v53 = vld [vmem:[#allocation2 + $0x150] sm:$0xff] }
  0x42   : > { %v338_v54 = vld [vmem:[#allocation2 + $0x188] sm:$0xff]  ;;  %v2814_v55 = vld [vmem:[#allocation2 + $0x170] sm:$0xff] }
  0x43   : > { %v340_v56 = vld [vmem:[#allocation2 + $0x1a8] sm:$0xff]  ;;  %v339_v57 = vld [vmem:[#allocation2 + $0x190] sm:$0xff] }
  0x44   : > { %617 = vrot.lane.b32.xlu1 %v2748_v38, %s2473_s16  ;;  %v342_v59 = vld [vmem:[#allocation2 + $0x1c8] sm:$0xff]  ;;  %v341_v60 = vld [vmem:[#allocation2 + $0x1b0] sm:$0xff] }
  0x45   : > { %623 = vrot.lane.b32.xlu0 %v2756_v40, %s2473_s16  ;;  %v344_v61 = vld [vmem:[#allocation2 + $0x1e8] sm:$0xff]  ;;  %v343_v63 = vld [vmem:[#allocation2 + $0x1d0] sm:$0xff] }
  0x46   : > { %v345_v1 = vld [vmem:[#allocation2 + $0x1f0] sm:$0xff] }
  0x47   : > { %v2830_v2 = vld [vmem:[#allocation2 + $0x29] sm:$0xff]  ;;  %v2838_v5 = vld [vmem:[#allocation2 + $0x31] sm:$0xff] }
  0x48   : > { %621 = vrot.lane.b32.xlu1 %v2760_v41, %s2473_s16  ;;  %v2835_v4 = vld [vmem:[#allocation2 + $0x49] sm:$0xff]  ;;  %v2846_v7 = vld [vmem:[#allocation2 + $0x51] sm:$0xff] }
  0x49   : > { %627 = vrot.lane.b32.xlu0 %v2764_v42, %s2473_s16  ;;  %v2842_v6 = vld [vmem:[#allocation2 + $0x69] sm:$0xff]  ;;  %v2854_v9 = vld [vmem:[#allocation2 + $0x71] sm:$0xff] }
  0x4a   : > { %v2850_v8 = vld [vmem:[#allocation2 + $0x89] sm:$0xff]  ;;  %v355_v11 = vld [vmem:[#allocation2 + $0x91] sm:$0xff] }
  0x4b   : > { %v356_v10 = vld [vmem:[#allocation2 + $0xa9] sm:$0xff]  ;;  %v357_v13 = vld [vmem:[#allocation2 + $0xb1] sm:$0xff] }
  0x4c   : > { %625 = vrot.lane.b32.xlu1 %v2768_v43, %s2473_s16  ;;  %v358_v12 = vld [vmem:[#allocation2 + $0xc9] sm:$0xff]  ;;  %v359_v15 = vld [vmem:[#allocation2 + $0xd1] sm:$0xff] }
  0x4d   : > { %631 = vrot.lane.b32.xlu0 %v2772_v44, %s2473_s16  ;;  %v360_v14 = vld [vmem:[#allocation2 + $0xe9] sm:$0xff]  ;;  %v361_v17 = vld [vmem:[#allocation2 + $0xf1] sm:$0xff] }
  0x4e   : > { %v362_v16 = vld [vmem:[#allocation2 + $0x109] sm:$0xff]  ;;  %v363_v19 = vld [vmem:[#allocation2 + $0x111] sm:$0xff] }
  0x4f   : > { %v2867_v18 = vld [vmem:[#allocation2 + $0x129] sm:$0xff]  ;;  %v2875_v21 = vld [vmem:[#allocation2 + $0x131] sm:$0xff] }
  0x50   : > { %629 = vrot.lane.b32.xlu1 %v2776_v45, %s2473_s16  ;;  %v2872_v20 = vld [vmem:[#allocation2 + $0x149] sm:$0xff]  ;;  %v2883_v23 = vld [vmem:[#allocation2 + $0x151] sm:$0xff] }
  0x51   : > { %635 = vrot.lane.b32.xlu0 %v2780_v46, %s2473_s16  ;;  %v2879_v22 = vld [vmem:[#allocation2 + $0x169] sm:$0xff]  ;;  %v2891_v28 = vld [vmem:[#allocation2 + $0x171] sm:$0xff] }
  0x52   : > { %v2887_v24 = vld [vmem:[#allocation2 + $0x189] sm:$0xff]  ;;  %v2899_v34 = vld [vmem:[#allocation2 + $0x191] sm:$0xff] }
  0x53   : > { %v372_v29 = vld [vmem:[#allocation2 + $0x1a9] sm:$0xff]  ;;  %v373_v37 = vld [vmem:[#allocation2 + $0x1b1] sm:$0xff] }
  0x54   : > { %633 = vrot.lane.b32.xlu1 %v2784_v47, %s2473_s16  ;;  %v374_v35 = vld [vmem:[#allocation2 + $0x1c9] sm:$0xff] }
  0x55   : > { %639 = vrot.lane.b32.xlu0 %v2788_v48, %s2473_s16 }
  0x58   : > { %637 = vrot.lane.b32.xlu1 %v2792_v49, %s2473_s16 }
  0x59   : > { %643 = vrot.lane.b32.xlu0 %v2796_v50, %s2473_s16 }
  0x5c   : > { %641 = vrot.lane.b32.xlu1 %v2800_v51, %s2473_s16 }
  0x5d   : > { %647 = vrot.lane.b32.xlu0 %v2804_v52, %s2473_s16 }
  0x60   : > { %645 = vrot.lane.b32.xlu1 %v2808_v53, %s2473_s16 }
  0x61   : > { %651 = vrot.lane.b32.xlu0 %v338_v54, %s2473_s16  ;;  %v376_v54 = vld [vmem:[#allocation2 + $0x1e9] sm:$0xff] }
  0x64   : > { %649 = vrot.lane.b32.xlu1 %v2814_v55, %s2473_s16 }
  0x65   : > { %655 = vrot.lane.b32.xlu0 %v340_v56, %s2473_s16 }
  0x68   : > { %653 = vrot.lane.b32.xlu1 %v339_v57, %s2473_s16  ;;  %v375_v57 = vld [vmem:[#allocation2 + $0x1d1] sm:$0xff] }
  0x69   : > { %659 = vrot.lane.b32.xlu0 %v342_v59, %s2473_s16 }
  0x6c   : > { %657 = vrot.lane.b32.xlu1 %v341_v60, %s2473_s16  ;;  %v2918_v60 = vld [vmem:[#allocation2 + $0x27] sm:$0xff] }
  0x6d   : > { %663 = vrot.lane.b32.xlu0 %v344_v61, %s2473_s16  ;;  %4076 = vst [vmem:[#allocation8_spill] sm:$0xff] %v2918_v60  ;;  %v377_v61 = vld [vmem:[#allocation2 + $0x1f1] sm:$0xff] }
  0x70   : > { %661 = vrot.lane.b32.xlu1 %v343_v63, %s2473_s16 }
  0x71   : > { %731 = vrot.lane.b32.xlu0 %v346_v0, %s2474_s17  ;;  %v2927_v0 = vld [vmem:[#allocation2 + $0x47] sm:$0xff] }
  0x74   : > { %665 = vrot.lane.b32.xlu1 %v345_v1, %s2473_s16 }
  0x75   : > { %735 = vrot.lane.b32.xlu0 %v2830_v2, %s2474_s17 }
  0x78   : > { %733 = vrot.lane.b32.xlu1 %v347_v3, %s2474_s17  ;;  %v2933_v3 = vld [vmem:[#allocation2 + $0x2f] sm:$0xff] }
  0x79   : > { %739 = vrot.lane.b32.xlu0 %v2835_v4, %s2474_s17  ;;  %4080 = vst [vmem:[#allocation12_spill] sm:$0xff] %v2933_v3 }
  0x7c   : > { %737 = vrot.lane.b32.xlu1 %v2838_v5, %s2474_s17 }
  0x7d   : > { %743 = vrot.lane.b32.xlu0 %v2842_v6, %s2474_s17 }
  0x80   : > { %741 = vrot.lane.b32.xlu1 %v2846_v7, %s2474_s17 }
  0x81   : > { %747 = vrot.lane.b32.xlu0 %v2850_v8, %s2474_s17 }
  0x84   : > { %745 = vrot.lane.b32.xlu1 %v2854_v9, %s2474_s17 }
  0x85   : > { %751 = vrot.lane.b32.xlu0 %v356_v10, %s2474_s17 }
  0x86   : > { %v2895_v33 = vpop.permute.xlu0 %603 }
  0x88   : > { %749 = vrot.lane.b32.xlu1 %v355_v11, %s2474_s17  ;;  %v2939_v11 = vld [vmem:[#allocation2 + $0x67] sm:$0xff] }
  0x89   : > { %755 = vrot.lane.b32.xlu0 %v358_v12, %s2474_s17 }
  0x8a   : > { %v2902_v36 = vpop.permute.xlu0 %605 }
  0x8b   : > { %4071 = vst [vmem:[#allocation3_spill] sm:$0xff] %v2902_v36  ;;  %v408_v36 = vld [vmem:[#allocation2 + $0x207] sm:$0xff] }
  0x8c   : > { %753 = vrot.lane.b32.xlu1 %v357_v13, %s2474_s17  ;;  %v2945_v13 = vld [vmem:[#allocation2 + $0x4f] sm:$0xff] }
  0x8d   : > { %759 = vrot.lane.b32.xlu0 %v360_v14, %s2474_s17 }
  0x90   : > { %757 = vrot.lane.b32.xlu1 %v359_v15, %s2474_s17  ;;  %v2951_v15 = vld [vmem:[#allocation2 + $0x87] sm:$0xff] }
  0x91   : > { %763 = vrot.lane.b32.xlu0 %v362_v16, %s2474_s17 }
  0x94   : > { %761 = vrot.lane.b32.xlu1 %v361_v17, %s2474_s17  ;;  %v2957_v17 = vld [vmem:[#allocation2 + $0x6f] sm:$0xff] }
  0x95   : > { %767 = vrot.lane.b32.xlu0 %v2867_v18, %s2474_s17 }
  0x98   : > { %765 = vrot.lane.b32.xlu1 %v363_v19, %s2474_s17 }
  0x99   : > { %771 = vrot.lane.b32.xlu0 %v2872_v20, %s2474_s17 }
  0x9c   : > { %769 = vrot.lane.b32.xlu1 %v2875_v21, %s2474_s17 }
  0x9d   : > { %775 = vrot.lane.b32.xlu0 %v2879_v22, %s2474_s17 }
  0xa0   : > { %773 = vrot.lane.b32.xlu1 %v2883_v23, %s2474_s17 }
  0xa1   : > { %779 = vrot.lane.b32.xlu0 %v2887_v24, %s2474_s17 }
  0xa4   : > { %777 = vrot.lane.b32.xlu1 %v2891_v28, %s2474_s17 }
  0xa5   : > { %783 = vrot.lane.b32.xlu0 %v372_v29, %s2474_s17  ;;  %v2963_v29 = vld [vmem:[#allocation2 + $0xa7] sm:$0xff] }
  0xa8   : > { %781 = vrot.lane.b32.xlu1 %v2899_v34, %s2474_s17 }
  0xa9   : > { %787 = vrot.lane.b32.xlu0 %v374_v35, %s2474_s17 }
  0xaa   : > { %v2907_v39 = vpop.permute.xlu1 %607 }
  0xab   : > { %4072 = vst [vmem:[#allocation4_spill] sm:$0xff] %v2907_v39  ;;  %v2909_v56 = vpop.permute.xlu0 %611 }
  0xac   : > { %4073 = vst [vmem:[#allocation5_spill] sm:$0xff] %v2909_v56  ;;  %785 = vrot.lane.b32.xlu1 %v373_v37, %s2474_s17  ;;  %v2969_v37 = vld [vmem:[#allocation2 + $0x8f] sm:$0xff]  ;;  %v3011_v56 = vld [vmem:[#allocation2 + $0x147] sm:$0xff] }
  0xad   : > { %791 = vrot.lane.b32.xlu0 %v376_v54, %s2474_s17 }
  0xae   : > { %v2913_v58 = vpop.permute.xlu1 %609 }
  0xaf   : > { %4074 = vst [vmem:[#allocation6_spill] sm:$0xff] %v2913_v58  ;;  %v2915_v59 = vpop.permute.xlu0 %615 }
  0xb0   : > { %4075 = vst [vmem:[#allocation7_spill] sm:$0xff] %v2915_v59  ;;  %789 = vrot.lane.b32.xlu1 %v375_v57, %s2474_s17  ;;  %v294_v57 = vld [vmem:[#allocation2 + $0xc7] sm:$0xff] }
  0xb1   : > { %859 = vrot.lane.b32.xlu0 %v2918_v60, %s2475_s18  ;;  %v3053_v60 = vld [vmem:[#allocation2 + $0x18f] sm:$0xff] }
  0xb2   : > { %v2922_v62 = vpop.permute.xlu1 %613 }
  0xb3   : > { %4077 = vst [vmem:[#allocation9_spill] sm:$0xff] %v2922_v62  ;;  %v2924_v63 = vpop.permute.xlu0 %619 }
  0xb4   : > { %4078 = vst [vmem:[#allocation10_spill] sm:$0xff] %v2924_v63  ;;  %793 = vrot.lane.b32.xlu1 %v377_v61, %s2474_s17  ;;  %v297_v63 = vld [vmem:[#allocation2 + $0xef] sm:$0xff] }
  0xb5   : > { %863 = vrot.lane.b32.xlu0 %v2927_v0, %s2475_s18 }
  0xb6   : > { %v2931_v1 = vpop.permute.xlu1 %617 }
  0xb7   : > { %4079 = vst [vmem:[#allocation11_spill] sm:$0xff] %v2931_v1  ;;  %v2935_v10 = vpop.permute.xlu0 %623 }
  0xb8   : > { %4081 = vst [vmem:[#allocation13_spill] sm:$0xff] %v2935_v10  ;;  %861 = vrot.lane.b32.xlu1 %v2933_v3, %s2475_s18  ;;  %v295_v10 = vld [vmem:[#allocation2 + $0xcf] sm:$0xff] }
  0xb9   : > { %867 = vrot.lane.b32.xlu0 %v2939_v11, %s2475_s18 }
  0xba   : > { %v2943_v12 = vpop.permute.xlu1 %621 }
  0xbb   : > { %4082 = vst [vmem:[#allocation14_spill] sm:$0xff] %v2943_v12  ;;  %v2947_v14 = vpop.permute.xlu0 %627 }
  0xbc   : > { %4083 = vst [vmem:[#allocation15_spill] sm:$0xff] %v2947_v14  ;;  %865 = vrot.lane.b32.xlu1 %v2945_v13, %s2475_s18 }
  0xbd   : > { %871 = vrot.lane.b32.xlu0 %v2951_v15, %s2475_s18 }
  0xbe   : > { %v2955_v16 = vpop.permute.xlu1 %625 }
  0xbf   : > { %4084 = vst [vmem:[#allocation16_spill] sm:$0xff] %v2955_v16  ;;  %v2959_v19 = vpop.permute.xlu0 %631 }
  0xc0   : > { %4085 = vst [vmem:[#allocation17_spill] sm:$0xff] %v2959_v19  ;;  %869 = vrot.lane.b32.xlu1 %v2957_v17, %s2475_s18  ;;  %v2978_v19 = vld [vmem:[#allocation2 + $0xaf] sm:$0xff] }
  0xc1   : > { %875 = vrot.lane.b32.xlu0 %v2963_v29, %s2475_s18 }
  0xc2   : > { %v2967_v35 = vpop.permute.xlu1 %629 }
  0xc3   : > { %4086 = vst [vmem:[#allocation18_spill] sm:$0xff] %v2967_v35  ;;  %v2971_v54 = vpop.permute.xlu0 %635  ;;  %v296_v35 = vld [vmem:[#allocation2 + $0xe7] sm:$0xff] }
  0xc4   : > { %873 = vrot.lane.b32.xlu1 %v2969_v37, %s2475_s18 }
  0xc5   : > { %879 = vrot.lane.b32.xlu0 %v294_v57, %s2475_s18  ;;  %v2990_v57 = vld [vmem:[#allocation2 + $0x107] sm:$0xff] }
  0xc6   : > { %v2976_v61 = vpop.permute.xlu1 %633 }
  0xc7   : > { %4087 = vst [vmem:[#allocation19_spill] sm:$0xff] %v2976_v61  ;;  %v2980_v14 = vpop.permute.xlu0 %639 }
  0xc8   : > { %4088 = vst [vmem:[#allocation20_spill] sm:$0xff] %v2980_v14  ;;  %877 = vrot.lane.b32.xlu1 %v2978_v19, %s2475_s18 }
  0xc9   : > { %883 = vrot.lane.b32.xlu0 %v296_v35, %s2475_s18  ;;  %v2999_v35 = vld [vmem:[#allocation2 + $0x127] sm:$0xff] }
  0xca   : > { %v2985_v16 = vpop.permute.xlu1 %637  ;;  %4093 = vst [vmem:[#allocation25_spill] sm:$0xff] %v2999_v35 }
  0xcb   : > { %4089 = vst [vmem:[#allocation21_spill] sm:$0xff] %v2985_v16  ;;  %v2987_v12 = vpop.permute.xlu0 %643  ;;  %v3074_v16 = vld [vmem:[#allocation2 + $0x1cf] sm:$0xff] }
  0xcc   : > { %4090 = vst [vmem:[#allocation22_spill] sm:$0xff] %v2987_v12  ;;  %881 = vrot.lane.b32.xlu1 %v295_v10, %s2475_s18  ;;  %v3005_v10 = vld [vmem:[#allocation2 + $0x10f] sm:$0xff] }
  0xcd   : > { %887 = vrot.lane.b32.xlu0 %v2990_v57, %s2475_s18  ;;  %4095 = vst [vmem:[#allocation27_spill] sm:$0xff] %v3005_v10 }
  0xce   : > { %v2994_v61 = vpop.permute.xlu1 %641 }
  0xcf   : > { %4091 = vst [vmem:[#allocation23_spill] sm:$0xff] %v2994_v61  ;;  %v2996_v1 = vpop.permute.xlu0 %647  ;;  %v3029_v61 = vld [vmem:[#allocation2 + $0x14f] sm:$0xff] }
  0xd0   : > { %4092 = vst [vmem:[#allocation24_spill] sm:$0xff] %v2996_v1  ;;  %885 = vrot.lane.b32.xlu1 %v297_v63, %s2475_s18  ;;  %v3017_v1 = vld [vmem:[#allocation2 + $0x12f] sm:$0xff] }
  0xd1   : > { %891 = vrot.lane.b32.xlu0 %v2999_v35, %s2475_s18  ;;  %4098 = vst [vmem:[#allocation30_spill] sm:$0xff] %v3017_v1  ;;  %v3065_v35 = vld [vmem:[#allocation2 + $0x1af] sm:$0xff] }
  0xd2   : > { %v3003_v59 = vpop.permute.xlu1 %645 }
  0xd3   : > { %4094 = vst [vmem:[#allocation26_spill] sm:$0xff] %v3003_v59  ;;  %v3007_v62 = vpop.permute.xlu0 %651  ;;  %v3023_v59 = vld [vmem:[#allocation2 + $0x167] sm:$0xff] }
  0xd4   : > { %4096 = vst [vmem:[#allocation28_spill] sm:$0xff] %v3007_v62  ;;  %889 = vrot.lane.b32.xlu1 %v3005_v10, %s2475_s18 }
  0xd5   : > { %895 = vrot.lane.b32.xlu0 %v3011_v56, %s2475_s18 }
  0xd6   : > { %v3015_v63 = vpop.permute.xlu1 %649 }
  0xd7   : > { %4097 = vst [vmem:[#allocation29_spill] sm:$0xff] %v3015_v63  ;;  %v3019_v12 = vpop.permute.xlu0 %655  ;;  %v3035_v63 = vld [vmem:[#allocation2 + $0x187] sm:$0xff] }
  0xd8   : > { %4099 = vst [vmem:[#allocation31_spill] sm:$0xff] %v3019_v12  ;;  %893 = vrot.lane.b32.xlu1 %v3017_v1, %s2475_s18  ;;  %v3041_v1 = vld [vmem:[#allocation2 + $0x16f] sm:$0xff] }
  0xd9   : > { %899 = vrot.lane.b32.xlu0 %v3023_v59, %s2475_s18 }
  0xda   : > { %v3027_v62 = vpop.permute.xlu1 %653 }
  0xdb   : > { %4100 = vst [vmem:[#allocation32_spill] sm:$0xff] %v3027_v62  ;;  %v3031_v3 = vpop.permute.xlu0 %659  ;;  %v3047_v62 = vld [vmem:[#allocation2 + $0x1a7] sm:$0xff] }
  0xdc   : > { %4101 = vst [vmem:[#allocation33_spill] sm:$0xff] %v3031_v3  ;;  %897 = vrot.lane.b32.xlu1 %v3029_v61, %s2475_s18 }
  0xdd   : > { %903 = vrot.lane.b32.xlu0 %v3035_v63, %s2475_s18 }
  0xde   : > { %v3039_v12 = vpop.permute.xlu1 %657 }
  0xdf   : > { %4102 = vst [vmem:[#allocation34_spill] sm:$0xff] %v3039_v12  ;;  %v3043_v58 = vpop.permute.xlu0 %663  ;;  %v3059_v12 = vld [vmem:[#allocation2 + $0x1c7] sm:$0xff] }
  0xe0   : > { %4103 = vst [vmem:[#allocation35_spill] sm:$0xff] %v3043_v58  ;;  %901 = vrot.lane.b32.xlu1 %v3041_v1, %s2475_s18  ;;  %4106 = vst [vmem:[#allocation38_spill] sm:$0xff] %v3059_v12 }
  0xe1   : > { %907 = vrot.lane.b32.xlu0 %v3047_v62, %s2475_s18 }
  0xe2   : > { %v3051_v3 = vpop.permute.xlu1 %661 }
  0xe3   : > { %4104 = vst [vmem:[#allocation36_spill] sm:$0xff] %v3051_v3  ;;  %v3055_v39 = vpop.permute.xlu0 %731  ;;  %v312_v3 = vld [vmem:[#allocation2 + $0x1e7] sm:$0xff] }
  0xe4   : > { %4105 = vst [vmem:[#allocation37_spill] sm:$0xff] %v3055_v39  ;;  %905 = vrot.lane.b32.xlu1 %v3053_v60, %s2475_s18 }
  0xe5   : > { %911 = vrot.lane.b32.xlu0 %v3059_v12, %s2475_s18 }
  0xe6   : > { %v3063_v58 = vpop.permute.xlu1 %665 }
  0xe7   : > { %4107 = vst [vmem:[#allocation39_spill] sm:$0xff] %v3063_v58  ;;  %v3067_v14 = vpop.permute.xlu0 %735 }
  0xe8   : > { %4108 = vst [vmem:[#allocation40_spill] sm:$0xff] %v3067_v14  ;;  %909 = vrot.lane.b32.xlu1 %v3065_v35, %s2475_s18  ;;  %v313_v14 = vld [vmem:[#allocation2 + $0x1ef] sm:$0xff] }
  0xe9   : > { %915 = vrot.lane.b32.xlu0 %v312_v3, %s2475_s18  ;;  %v409_v3 = vld [vmem:[#allocation2 + $0x20f] sm:$0xff] }
  0xea   : > { %v3072_v10 = vpop.permute.xlu1 %733 }
  0xeb   : > { %4109 = vst [vmem:[#allocation41_spill] sm:$0xff] %v3072_v10  ;;  %v3076_v39 = vpop.permute.xlu0 %739 }
  0xec   : > { %4110 = vst [vmem:[#allocation42_spill] sm:$0xff] %v3076_v39  ;;  %913 = vrot.lane.b32.xlu1 %v3074_v16, %s2475_s18 }
  0xed   : > { %919 = vrot.lane.b32.xlu0 %v408_v36, %s2475_s18 }
  0xee   : > { %v3081_v58 = vpop.permute.xlu1 %737 }
  0xef   : > { %4111 = vst [vmem:[#allocation43_spill] sm:$0xff] %v3081_v58  ;;  %v3083_v12 = vpop.permute.xlu0 %743 }
  0xf0   : > { %917 = vrot.lane.b32.xlu1 %v313_v14, %s2475_s18 }
  0xf1   : > { %987 = vrot.lane.b32.xlu0 %v2711_v25, %s2476_s19 }
  0xf2   : > { %v3088_v10 = vpop.permute.xlu1 %741 }
  0xf3   : > { %v3090_v39 = vpop.permute.xlu0 %747 }
  0xf4   : > { %4112 = vst [vmem:[#allocation44_spill] sm:$0xff] %v3090_v39  ;;  %921 = vrot.lane.b32.xlu1 %v409_v3, %s2475_s18 }
  0xf5   : > { %991 = vrot.lane.b32.xlu0 %v2713_v26, %s2476_s19 }
  0xf6   : > { %v3095_v36 = vpop.permute.xlu1 %745 }
  0xf7   : > { %v3097_v58 = vpop.permute.xlu0 %751 }
  0xf8   : > { %4113 = vst [vmem:[#allocation45_spill] sm:$0xff] %v3097_v58  ;;  %989 = vrot.lane.b32.xlu1 %v2720_v27, %s2476_s19 }
  0xf9   : > { %995 = vrot.lane.b32.xlu0 %v2728_v30, %s2476_s19 }
  0xfa   : > { %v3103_v25 = vpop.permute.xlu1 %749 }
  0xfb   : > { %4114 = vst [vmem:[#allocation46_spill] sm:$0xff] %v3103_v25  ;;  %v3105_v14 = vpop.permute.xlu0 %755 }
  0xfc   : > { %4115 = vst [vmem:[#allocation47_spill] sm:$0xff] %v3105_v14  ;;  %993 = vrot.lane.b32.xlu1 %v2732_v31, %s2476_s19 }
  0xfd   : > { %999 = vrot.lane.b32.xlu0 %v2736_v32, %s2476_s19 }
  0xfe   : > { %v3111_v3 = vpop.permute.xlu1 %753 }
  0xff   : > { %4116 = vst [vmem:[#allocation48_spill] sm:$0xff] %v3111_v3  ;;  %v3113_v39 = vpop.permute.xlu0 %759 }
 0x100   : > { %4117 = vst [vmem:[#allocation49_spill] sm:$0xff] %v3113_v39  ;;  %997 = vrot.lane.b32.xlu1 %v2748_v38, %s2476_s19 }
 0x101   : > { %1003 = vrot.lane.b32.xlu0 %v2756_v40, %s2476_s19 }
 0x102   : > { %v3119_v27 = vpop.permute.xlu1 %757 }
 0x103   : > { %4118 = vst [vmem:[#allocation50_spill] sm:$0xff] %v3119_v27  ;;  %v3121_v30 = vpop.permute.xlu0 %763 }
 0x104   : > { %1001 = vrot.lane.b32.xlu1 %v2760_v41, %s2476_s19 }
 0x105   : > { %1007 = vrot.lane.b32.xlu0 %v2764_v42, %s2476_s19 }
 0x106   : > { %v3127_v32 = vpop.permute.xlu1 %761 }
 0x107   : > { %4119 = vst [vmem:[#allocation51_spill] sm:$0xff] %v3127_v32  ;;  %v3129_v14 = vpop.permute.xlu0 %767  ;;  %v1860_v32 = vld [vmem:[%s4062_s1 + $0x10] sm:$0xff] }
 0x108   : > { %1005 = vrot.lane.b32.xlu1 %v2768_v43, %s2476_s19 }
 0x109   : > { %1011 = vrot.lane.b32.xlu0 %v2772_v44, %s2476_s19 }
 0x10a   : > { %v3135_v38 = vpop.permute.xlu1 %765 }
 0x10b   : > { %v3137_v40 = vpop.permute.xlu0 %771 }
 0x10c   : > { %1009 = vrot.lane.b32.xlu1 %v2776_v45, %s2476_s19 }
 0x10d   : > { %1015 = vrot.lane.b32.xlu0 %v2780_v46, %s2476_s19 }
 0x10e   : > { %v3143_v41 = vpop.permute.xlu1 %769 }
 0x10f   : > { %v3145_v42 = vpop.permute.xlu0 %775 }
 0x110   : > { %1013 = vrot.lane.b32.xlu1 %v2784_v47, %s2476_s19 }
 0x111   : > { %1019 = vrot.lane.b32.xlu0 %v2788_v48, %s2476_s19 }
 0x112   : > { %v3151_v43 = vpop.permute.xlu1 %773 }
 0x113   : > { %v3153_v44 = vpop.permute.xlu0 %779 }
 0x114   : > { %4120 = vst [vmem:[#allocation52_spill] sm:$0xff] %v3153_v44  ;;  %1017 = vrot.lane.b32.xlu1 %v2792_v49, %s2476_s19 }
 0x115   : > { %1115 = vrot.lane.b32.xlu0 %v2830_v2, %s2477_s20 }
 0x116   : > { %v3159_v45 = vpop.permute.xlu1 %777 }
 0x117   : > { %4121 = vst [vmem:[#allocation53_spill] sm:$0xff] %v3159_v45  ;;  %v3161_v46 = vpop.permute.xlu0 %783  ;;  %v4154_v45 = vld [vmem:[#allocation37_spill] sm:$0xff] }
 0x118   : > { %4122 = vst [vmem:[#allocation54_spill] sm:$0xff] %v3161_v46  ;;  %1021 = vrot.lane.b32.xlu1 %v2800_v51, %s2476_s19  ;;  %v448_v46 = vld [vmem:[#allocation2 + $0x89] sm:$0xff] }
 0x119   : > { %1117 = vrot.lane.b32.xlu0 %v2838_v5, %s2477_s20  ;;  %v1862_v5 = vld [vmem:[%s4062_s1 + $0x20] sm:$0xf] }
 0x11a   : > { %v3167_v47 = vpop.permute.xlu1 %781  ;;  %2359 = vmatprep.subr.msk.mxu0 %vm1960_vm1, %v1862_v5  ;;  %2417 = vmatprep.subr.msk.mxu1 %vm1960_vm1, %v1862_v5 }
 0x11b   : > { %4123 = vst [vmem:[#allocation55_spill] sm:$0xff] %v3167_v47  ;;  %v3169_v48 = vpop.permute.xlu0 %787  ;;  %2360 = vmatpush3.msk.msra.mxu0 %vm1960_vm1, %v1862_v5  ;;  %2422 = vmatpush3.msk.msra.mxu1 %vm1960_vm1, %v1862_v5  ;;  %v1858_v5 = vld [vmem:[%s4062_s1] sm:$0xff]  ;;  %v544_v47 = vld [vmem:[#allocation2 + $0x91] sm:$0xff] }
 0x11c   : > { %4124 = vst [vmem:[#allocation56_spill] sm:$0xff] %v3169_v48  ;;  %1147 = vrot.lane.b32.xlu1 %v2867_v18, %s2477_s20 }
 0x11d   : > { %1243 = vrot.lane.b32.xlu0 %v2927_v0, %s2478_s21 }
 0x11e   : > { %v3175_v49 = vpop.permute.xlu1 %785 }
 0x11f   : > { %4125 = vst [vmem:[#allocation57_spill] sm:$0xff] %v3175_v49  ;;  %v3177_v2 = vpop.permute.xlu0 %791 }
 0x120   : > { %4126 = vst [vmem:[#allocation58_spill] sm:$0xff] %v3177_v2  ;;  %1149 = vrot.lane.b32.xlu1 %v2875_v21, %s2477_s20  ;;  %v1861_v21 = vld [vmem:[%s4062_s1 + $0x18] sm:$0xff] }
 0x121   : > { %1245 = vrot.lane.b32.xlu0 %v2945_v13, %s2478_s21  ;;  %2361 = vmatprep.subr.mxu0 %v1861_v21 }
 0x122   : > { %v3183_v51 = vpop.permute.xlu1 %789  ;;  %2362 = vmatpush3.msra.mxu0 %v1861_v21  ;;  %2418 = vmatprep.subr.mxu1 %v1861_v21 }
 0x123   : > { %4127 = vst [vmem:[#allocation59_spill] sm:$0xff] %v3183_v51  ;;  %v3188_v18 = vpop.permute.xlu0 %859  ;;  %2363 = vmatprep.subr.mxu0 %v1860_v32  ;;  %2423 = vmatpush3.msra.mxu1 %v1861_v21 }
 0x124   : > { %1275 = vrot.lane.b32.xlu1 %v3011_v56, %s2478_s21  ;;  %2364 = vmatpush3.msra.mxu0 %v1860_v32 }
 0x125   : > { %1371 = vrot.lane.b32.xlu0 %v2713_v26, %s2479_s26  ;;  %v1859_v26 = vld [vmem:[%s4062_s1 + $0x8] sm:$0xff]  ;;  %2419 = vmatprep.subr.mxu1 %v1860_v32 }
 0x126   : > { %v3197_v2 = vpop.permute.xlu1 %793  ;;  %2365 = vmatprep.subr.mxu0 %v1859_v26  ;;  %2424 = vmatpush3.msra.mxu1 %v1860_v32 }
 0x127   : > { %4128 = vst [vmem:[#allocation60_spill] sm:$0xff] %v3197_v2  ;;  %v3202_v39 = vpop.permute.xlu0 %863  ;;  %2366 = vmatpush3.msra.mxu0 %v1859_v26  ;;  %2420 = vmatprep.subr.mxu1 %v1859_v26 }
 0x128   : > { %1277 = vrot.lane.b32.xlu1 %v3029_v61, %s2478_s21  ;;  %2367 = vmatprep.subr.mxu0 %v1858_v5 }
 0x129   : > { %1023 = vrot.lane.b32.xlu0 %v2796_v50, %s2476_s19  ;;  %2368 = vmatpush3.msra.mxu0 %v1858_v5 }
 0x12a   : > { %v3211_v2 = vpop.permute.xlu1 %861  ;;  %2425 = vmatpush3.msra.mxu1 %v1859_v26 }
 0x12b   : > { %v3216_v51 = vpop.permute.xlu0 %867  ;;  %2421 = vmatprep.subr.mxu1 %v1858_v5 }
 0x12c   : > { %1403 = vrot.lane.b32.xlu1 %v2796_v50, %s2479_s26  ;;  %2426 = vmatpush3.msra.mxu1 %v1858_v5 }
 0x12d   : > { %1405 = vrot.lane.b32.xlu0 %v2808_v53, %s2479_s26 }
 0x12e   : > { %v3222_v27 = vpop.permute.xlu1 %865 }
 0x12f   : > { %v3224_v48 = vpop.permute.xlu0 %871 }
 0x130   : > { %1373 = vrot.lane.b32.xlu1 %v2732_v31, %s2479_s26 }
 0x131   : > { %1531 = vrot.lane.b32.xlu0 %v2872_v20, %s2480_s5 }
 0x132   : > { %v3230_v50 = vpop.permute.xlu1 %869 }
 0x133   : > { %v3232_v21 = vpop.permute.xlu0 %875 }
 0x134   : > { %4129 = vst [vmem:[#allocation61_spill] sm:$0xff] %v3232_v21  ;;  %1499 = vrot.lane.b32.xlu1 %v2835_v4, %s2480_s5  ;;  %v545_v21 = vld [vmem:[#allocation2 + $0xa9] sm:$0xff] }
 0x135   : > { %1119 = vrot.lane.b32.xlu0 %v2835_v4, %s2477_s20 }
 0x136   : > { %v3238_v32 = vpop.permute.xlu1 %873 }
 0x137   : > { %v3240_v31 = vpop.permute.xlu0 %879 }
 0x138   : > { %4130 = vst [vmem:[#allocation62_spill] sm:$0xff] %v3240_v31  ;;  %1025 = vrot.lane.b32.xlu1 %v2808_v53, %s2476_s19 }
 0x139   : > { %1501 = vrot.lane.b32.xlu0 %v2846_v7, %s2480_s5 }
 0x13a   : > { %v3246_v26 = vpop.permute.xlu1 %877 }
 0x13b   : > { %4131 = vst [vmem:[#allocation63_spill] sm:$0xff] %v3246_v26  ;;  %v3248_v5 = vpop.permute.xlu0 %883 }
 0x13c   : > { %4132 = vst [vmem:[#allocation64_spill] sm:$0xff] %v3248_v5  ;;  %1151 = vrot.lane.b32.xlu1 %v2872_v20, %s2477_s20  ;;  %v509_v20 = vld [vmem:[#allocation2 + $0x68] sm:$0xff] }
 0x13d   : > { %1121 = vrot.lane.b32.xlu0 %v2846_v7, %s2477_s20 }
 0x13e   : > { %v3254_v4 = vpop.permute.xlu1 %881 }
 0x13f   : > { %4133 = vst [vmem:[#allocation65_spill] sm:$0xff] %v3254_v4  ;;  %v3256_v49 = vpop.permute.xlu0 %887 }
 0x140   : > { %4134 = vst [vmem:[#allocation66_spill] sm:$0xff] %v3256_v49  ;;  %1533 = vrot.lane.b32.xlu1 %v2883_v23, %s2480_s5 }
 0x141   : > { %1247 = vrot.lane.b32.xlu0 %v2939_v11, %s2478_s21 }
 0x142   : > { %v3262_v53 = vpop.permute.xlu1 %885 }
 0x143   : > { %4135 = vst [vmem:[#allocation67_spill] sm:$0xff] %v3262_v53  ;;  %v3264_v3 = vpop.permute.xlu0 %891 }
 0x144   : > { %1153 = vrot.lane.b32.xlu1 %v2883_v23, %s2477_s20 }
 0x145   : > { %1249 = vrot.lane.b32.xlu0 %v2957_v17, %s2478_s21 }
 0x146   : > { %v3270_v7 = vpop.permute.xlu1 %889 }
 0x147   : > { %4136 = vst [vmem:[#allocation68_spill] sm:$0xff] %v3270_v7  ;;  %v3272_v49 = vpop.permute.xlu0 %895 }
 0x148   : > { %1279 = vrot.lane.b32.xlu1 %v3023_v59, %s2478_s21  ;;  %v510_v59 = vld [vmem:[#allocation2 + $0x70] sm:$0xff] }
 0x149   : > { %1375 = vrot.lane.b32.xlu0 %v509_v20, %s2479_s26 }
 0x14a   : > { %v3277_v11 = vpop.permute.xlu1 %893 }
 0x14b   : > { %v3279_v53 = vpop.permute.xlu0 %899 }
 0x14c   : > { %1281 = vrot.lane.b32.xlu1 %v3041_v1, %s2478_s21 }
 0x14d   : > { %1027 = vrot.lane.b32.xlu0 %v2804_v52, %s2476_s19 }
 0x14e   : > { %v3285_v23 = vpop.permute.xlu1 %897 }
 0x14f   : > { %v3287_v17 = vpop.permute.xlu0 %903 }
 0x150   : > { %1407 = vrot.lane.b32.xlu1 %v2804_v52, %s2479_s26 }
 0x151   : > { %1409 = vrot.lane.b32.xlu0 %v2814_v55, %s2479_s26 }
 0x152   : > { %v3293_v20 = vpop.permute.xlu1 %901 }
 0x153   : > { %v3295_v7 = vpop.permute.xlu0 %907 }
 0x154   : > { %4137 = vst [vmem:[#allocation69_spill] sm:$0xff] %v3295_v7  ;;  %1377 = vrot.lane.b32.xlu1 %v510_v59, %s2479_s26 }
 0x155   : > { %1535 = vrot.lane.b32.xlu0 %v2879_v22, %s2480_s5 }
 0x156   : > { %v3300_v1 = vpop.permute.xlu1 %905 }
 0x157   : > { %4138 = vst [vmem:[#allocation70_spill] sm:$0xff] %v3300_v1  ;;  %v3302_v5 = vpop.permute.xlu0 %911 }
 0x158   : > { %4139 = vst [vmem:[#allocation71_spill] sm:$0xff] %v3302_v5  ;;  %1503 = vrot.lane.b32.xlu1 %v2842_v6, %s2480_s5 }
 0x159   : > { %1123 = vrot.lane.b32.xlu0 %v2842_v6, %s2477_s20 }
 0x15a   : > { %v3308_v52 = vpop.permute.xlu1 %909 }
 0x15b   : > { %4140 = vst [vmem:[#allocation72_spill] sm:$0xff] %v3308_v52  ;;  %v3310_v4 = vpop.permute.xlu0 %915 }
 0x15c   : > { %4141 = vst [vmem:[#allocation73_spill] sm:$0xff] %v3310_v4  ;;  %1029 = vrot.lane.b32.xlu1 %v2814_v55, %s2476_s19 }
 0x15d   : > { %1505 = vrot.lane.b32.xlu0 %v2854_v9, %s2480_s5 }
 0x15e   : > { %v3316_v59 = vpop.permute.xlu1 %913 }
 0x15f   : > { %4142 = vst [vmem:[#allocation74_spill] sm:$0xff] %v3316_v59  ;;  %v3318_v31 = vpop.permute.xlu0 %919 }
 0x160   : > { %4143 = vst [vmem:[#allocation75_spill] sm:$0xff] %v3318_v31  ;;  %1155 = vrot.lane.b32.xlu1 %v2879_v22, %s2477_s20  ;;  %v511_v22 = vld [vmem:[#allocation2 + $0x88] sm:$0xff] }
 0x161   : > { %1125 = vrot.lane.b32.xlu0 %v2854_v9, %s2477_s20 }
 0x162   : > { %v3324_v6 = vpop.permute.xlu1 %917 }
 0x163   : > { %4144 = vst [vmem:[#allocation76_spill] sm:$0xff] %v3324_v6  ;;  %v3326_v58 = vpop.permute.xlu0 %987 }
 0x164   : > { %1537 = vrot.lane.b32.xlu1 %v2891_v28, %s2480_s5 }
 0x165   : > { %1251 = vrot.lane.b32.xlu0 %v2951_v15, %s2478_s21 }
 0x166   : > { %v3332_v55 = vpop.permute.xlu1 %921 }
 0x167   : > { %4145 = vst [vmem:[#allocation77_spill] sm:$0xff] %v3332_v55  ;;  %v3334_v4 = vpop.permute.xlu0 %991  ;;  %v432_v55 = vld [vmem:[#allocation2 + $0x188] sm:$0xff] }
 0x168   : > { %1157 = vrot.lane.b32.xlu1 %v2891_v28, %s2477_s20 }
 0x169   : > { %1253 = vrot.lane.b32.xlu0 %v2969_v37, %s2478_s21  ;;  %v528_v37 = vld [vmem:[#allocation2 + $0x190] sm:$0xff] }
 0x16a   : > { %v3340_v9 = vpop.permute.xlu1 %989 }
 0x16b   : > { %v3342_v31 = vpop.permute.xlu0 %995 }
 0x16c   : > { %1283 = vrot.lane.b32.xlu1 %v3035_v63, %s2478_s21  ;;  %v512_v63 = vld [vmem:[#allocation2 + $0x90] sm:$0xff] }
 0x16d   : > { %1379 = vrot.lane.b32.xlu0 %v511_v22, %s2479_s26 }
 0x16e   : > { %v3347_v15 = vpop.permute.xlu1 %993 }
 0x16f   : > { %v3349_v6 = vpop.permute.xlu0 %999 }
 0x170   : > { %1285 = vrot.lane.b32.xlu1 %v3053_v60, %s2478_s21 }
 0x171   : > { %1031 = vrot.lane.b32.xlu0 %v432_v55, %s2476_s19 }
 0x172   : > { %v3354_v28 = vpop.permute.xlu1 %997 }
 0x173   : > { %v3356_v59 = vpop.permute.xlu0 %1003 }
 0x174   : > { %4146 = vst [vmem:[#allocation78_spill] sm:$0xff] %v3356_v59  ;;  %1411 = vrot.lane.b32.xlu1 %v432_v55, %s2479_s26  ;;  %v282_v59 = vld [vmem:[#allocation2 + $0x7] sm:$0xff] }
 0x175   : > { %1413 = vrot.lane.b32.xlu0 %v528_v37, %s2479_s26  ;;  %v1595_v44 = vsel %vm176_vm0, %v282_v59, %v2895_v33 }
 0x176   : > { %v3360_v22 = vpop.permute.xlu1 %1001 }
 0x177   : > { %v3362_v5 = vpop.permute.xlu0 %1007 }
 0x178   : > { %4147 = vst [vmem:[#allocation79_spill] sm:$0xff] %v3362_v5  ;;  %1381 = vrot.lane.b32.xlu1 %v512_v63, %s2479_s26 }
 0x179   : > { %1539 = vrot.lane.b32.xlu0 %v2887_v24, %s2480_s5 }
 0x17a   : > { %v3367_v60 = vpop.permute.xlu1 %1005 }
 0x17b   : > { %4148 = vst [vmem:[#allocation80_spill] sm:$0xff] %v3367_v60  ;;  %v3369_v52 = vpop.permute.xlu0 %1011  ;;  %v514_v60 = vld [vmem:[#allocation2 + $0xb0] sm:$0xff] }
 0x17c   : > { %4149 = vst [vmem:[#allocation81_spill] sm:$0xff] %v3369_v52  ;;  %1507 = vrot.lane.b32.xlu1 %v2850_v8, %s2480_s5 }
 0x17d   : > { %1127 = vrot.lane.b32.xlu0 %v448_v46, %s2477_s20 }
 0x17e   : > { %v3374_v55 = vpop.permute.xlu1 %1009 }
 0x17f   : > { %4150 = vst [vmem:[#allocation82_spill] sm:$0xff] %v3374_v55  ;;  %v3376_v26 = vpop.permute.xlu0 %1015 }
 0x180   : > { %4151 = vst [vmem:[#allocation83_spill] sm:$0xff] %v3376_v26  ;;  %1033 = vrot.lane.b32.xlu1 %v528_v37, %s2476_s19 }
 0x181   : > { %1509 = vrot.lane.b32.xlu0 %v544_v47, %s2480_s5 }
 0x182   : > { %v3380_v63 = vpop.permute.xlu1 %1013 }
 0x183   : > { %4152 = vst [vmem:[#allocation84_spill] sm:$0xff] %v3380_v63  ;;  %v1020_v5 = vpop.permute.xlu0 %1019 }
 0x184   : > { %1159 = vrot.lane.b32.xlu1 %v2887_v24, %s2477_s20 }
 0x185   : > { %1129 = vrot.lane.b32.xlu0 %v544_v47, %s2477_s20  ;;  %v513_v47 = vld [vmem:[#allocation2 + $0xa8] sm:$0xff] }
 0x186   : > { %v3385_v8 = vpop.permute.xlu1 %1017 }
 0x187   : > { %4153 = vst [vmem:[#allocation85_spill] sm:$0xff] %v3385_v8  ;;  %v1116_v46 = vpop.permute.xlu0 %1115 }
 0x188   : > { %1541 = vrot.lane.b32.xlu1 %v2899_v34, %s2480_s5 }
 0x189   : > { %1255 = vrot.lane.b32.xlu0 %v2963_v29, %s2478_s21  ;;  %v434_v29 = vld [vmem:[#allocation2 + $0x1a8] sm:$0xff] }
 0x18a   : > { %v3391_v37 = vpop.permute.xlu1 %1021 }
 0x18b   : > { %v3393_v26 = vpop.permute.xlu0 %1117 }
 0x18c   : > { %1161 = vrot.lane.b32.xlu1 %v2899_v34, %s2477_s20 }
 0x18d   : > { %1257 = vrot.lane.b32.xlu0 %v2978_v19, %s2478_s21  ;;  %v530_v19 = vld [vmem:[#allocation2 + $0x1b0] sm:$0xff] }
 0x18e   : > { %v1148_v24 = vpop.permute.xlu1 %1147 }
 0x18f   : > { %v1244_v8 = vpop.permute.xlu0 %1243 }
 0x190   : > { %1287 = vrot.lane.b32.xlu1 %v3047_v62, %s2478_s21 }
 0x191   : > { %1383 = vrot.lane.b32.xlu0 %v513_v47, %s2479_s26  ;;  %v561_v47 = vld [vmem:[#allocation2 + $0x1a9] sm:$0xff] }
 0x192   : > { %v3402_v63 = vpop.permute.xlu1 %1149 }
 0x193   : > { %v3404_v52 = vpop.permute.xlu0 %1245 }
 0x194   : > { %1289 = vrot.lane.b32.xlu1 %v3065_v35, %s2478_s21  ;;  %v1611_v35 = vsel %vm176_vm0, %v2990_v57, %v2971_v54  ;;  %v1628_v54 = vsel %vm1627_vm2, %v1595_v44, %v4154_v45  ;;  %v546_v44 = vld [vmem:[#allocation2 + $0xb1] sm:$0xff] }
 0x195   : > { %1035 = vrot.lane.b32.xlu0 %v434_v29, %s2476_s19  ;;  %v1644_v7 = vsel %vm1627_vm2, %v1611_v35, %v3121_v30  ;;  %v1661_v30 = vsel %vm1660_vm3, %v1628_v54, %v3188_v18 }
 0x196   : > { %v1276_v34 = vpop.permute.xlu1 %1275 }
 0x197   : > { %v1372_v55 = vpop.permute.xlu0 %1371 }
 0x198   : > { %1415 = vrot.lane.b32.xlu1 %v434_v29, %s2479_s26 }
 0x199   : > { %1417 = vrot.lane.b32.xlu0 %v530_v19, %s2479_s26 }
 0x19a   : > { %v3411_v62 = vpop.permute.xlu1 %1277 }
 0x19b   : > { %v3413_v25 = vpop.permute.xlu0 %1023 }
 0x19c   : > { %1385 = vrot.lane.b32.xlu1 %v514_v60, %s2479_s26  ;;  %v1677_v60 = vsel %vm1660_vm3, %v1644_v7, %v3264_v3  ;;  %v283_v3 = vld [vmem:[#allocation2 + $0xf] sm:$0xff]  ;;  %v1694_v7 = vsel %vm1693_vm4, %v1661_v30, %v3326_v58 }
 0x19d   : > { %1543 = vrot.lane.b32.xlu0 %v561_v47, %s2480_s5  ;;  %v1710_v57 = vsel %vm1693_vm4, %v1677_v60, %v1020_v5  ;;  %v1727_v45 = vsel %vm1726_vm5, %v1694_v7, %v1116_v46  ;;  %v4155_v60 = vld [vmem:[#allocation3_spill] sm:$0xff]  ;;  %v4156_v46 = vld [vmem:[#allocation41_spill] sm:$0xff] }
 0x19e   : > { %v1404_v29 = vpop.permute.xlu1 %1403  ;;  %v1743_v35 = vsel %vm1726_vm5, %v1710_v57, %v1148_v24  ;;  %v1596_v54 = vsel %vm176_vm0, %v283_v3, %v4155_v60  ;;  %v562_v30 = vld [vmem:[#allocation2 + $0x1b1] sm:$0xff]  ;;  %v483_v7 = vld [vmem:[#allocation2 + $0xc7] sm:$0xff] }
 0x19f   : > { %v1406_v1 = vpop.permute.xlu0 %1405  ;;  %v1776_v59 = vsel %vm1759_vm6, %v1743_v35, %v1276_v34 }
 0x1a0   : > { %1511 = vrot.lane.b32.xlu1 %v545_v21, %s2480_s5  ;;  %v1809_v18 = vsel %vm1792_vm8, %v1776_v59, %v1404_v29  ;;  %v1629_v29 = vsel %vm1627_vm2, %v1596_v54, %v4156_v46  ;;  %v4157_v59 = vld [vmem:[#allocation21_spill] sm:$0xff]  ;;  %v4159_v46 = vld [vmem:[#allocation38_spill] sm:$0xff] }
 0x1a1   : > { %1131 = vrot.lane.b32.xlu0 %v545_v21, %s2477_s20  ;;  %v1760_v21 = vsel %vm1759_vm6, %v1727_v45, %v1244_v8  ;;  %v1662_v8 = vsel %vm1660_vm3, %v1629_v29, %v3211_v2  ;;  %v4158_v45 = vld [vmem:[#allocation27_spill] sm:$0xff]  ;;  %v436_v29 = vld [vmem:[#allocation2 + $0x1c8] sm:$0xff] }
 0x1a2   : > { %v1374_v33 = vpop.permute.xlu1 %1373  ;;  %v1793_v58 = vsel %vm1792_vm8, %v1760_v21, %v1372_v55  ;;  %v1695_v55 = vsel %vm1693_vm4, %v1662_v8, %v3340_v9 }
 0x1a3   : > { %v1532_v5 = vpop.permute.xlu0 %1531  ;;  %v1728_v35 = vsel %vm1726_vm5, %v1695_v55, %v3393_v26  ;;  %v516_v55 = vld [vmem:[#allocation2 + $0xd0] sm:$0xff] }
 0x1a4   : > { %1037 = vrot.lane.b32.xlu1 %v530_v19, %s2476_s19  ;;  %v1842_v24 = vsel %vm1825_vm7, %v1809_v18, %v1532_v5  ;;  %v1761_v2 = vsel %vm1759_vm6, %v1728_v35, %v3404_v52  ;;  %v563_v35 = vld [vmem:[#allocation2 + $0x1c9] sm:$0xff] }
 0x1a5   : > { %1513 = vrot.lane.b32.xlu0 %v546_v44, %s2480_s5  ;;  %2393 = vmatprep.mubr.msk.f32.mxu1 %vm1863_vm9, %v1842_v24  ;;  %v1794_v18 = vsel %vm1792_vm8, %v1761_v2, %v1374_v33  ;;  %v484_v33 = vld [vmem:[#allocation2 + $0xcf] sm:$0xff] }
 0x1a6   : > { %v1500_v34 = vpop.permute.xlu1 %1499 }
 0x1a7   : > { %v1826_v57 = vsel %vm1825_vm7, %v1793_v58, %v1500_v34  ;;  %v3452_v19 = vpop.permute.xlu0 %1119  ;;  %v515_v34 = vld [vmem:[#allocation2 + $0xc8] sm:$0xff] }
 0x1a8   : > { %1163 = vrot.lane.b32.xlu1 %v561_v47, %s2477_s20  ;;  %2369 = vmatprep.mubr.msk.f32.mxu0 %vm1863_vm9, %v1826_v57  ;;  %v1612_v47 = vsel %vm176_vm0, %v4158_v45, %v4157_v59  ;;  %v532_v57 = vld [vmem:[#allocation2 + $0x1d0] sm:$0xff]  ;;  %v4160_v59 = vld [vmem:[#allocation20_spill] sm:$0xff] }
 0x1a9   : > { %1133 = vrot.lane.b32.xlu0 %v546_v44, %s2477_s20  ;;  %v1645_v26 = vsel %vm1627_vm2, %v1612_v47, %v3135_v38  ;;  %v4161_v45 = vld [vmem:[#allocation25_spill] sm:$0xff] }
 0x1aa   : > { %v3461_v3 = vpop.permute.xlu1 %1025  ;;  %v1678_v44 = vsel %vm1660_vm3, %v1645_v26, %v3277_v11  ;;  %v4163_v26 = vld [vmem:[#allocation8_spill] sm:$0xff] }
 0x1ab   : > { %v1502_v5 = vpop.permute.xlu0 %1501  ;;  %v1711_v21 = vsel %vm1693_vm4, %v1678_v44, %v3391_v37 }
 0x1ac   : > { %1545 = vrot.lane.b32.xlu1 %v562_v30, %s2480_s5  ;;  %v1827_v9 = vsel %vm1825_vm7, %v1794_v18, %v1502_v5  ;;  %v1744_v24 = vsel %vm1726_vm5, %v1711_v21, %v3402_v63  ;;  %v4162_v5 = vld [vmem:[#allocation4_spill] sm:$0xff] }
 0x1ad   : > { %1259 = vrot.lane.b32.xlu0 %v483_v7, %s2478_s21  ;;  %2370 = vmatmul.mubr.msk.f32.vlgmr.msra.gmra.mxu0 %vm1863_vm9, %v1827_v9  ;;  %v1777_v38 = vsel %vm1759_vm6, %v1744_v24, %v3411_v62  ;;  %v547_v7 = vld [vmem:[#allocation2 + $0xc9] sm:$0xff]  ;;  %v1597_v9 = vsel %vm176_vm0, %v4163_v26, %v4162_v5 }
 0x1ae   : > { %v1152_v52 = vpop.permute.xlu1 %1151  ;;  %v1810_v11 = vsel %vm1792_vm8, %v1777_v38, %v1406_v1 }
 0x1af   : > { %v3481_v60 = vpop.permute.xlu0 %1121 }
 0x1b0   : > { %1165 = vrot.lane.b32.xlu1 %v562_v30, %s2477_s20 }
 0x1b1   : > { %1261 = vrot.lane.b32.xlu0 %v484_v33, %s2478_s21  ;;  %v4164_v33 = vld [vmem:[#allocation40_spill] sm:$0xff] }
 0x1b2   : > { %v1534_v54 = vpop.permute.xlu1 %1533  ;;  %v1630_v24 = vsel %vm1627_vm2, %v1597_v9, %v4164_v33  ;;  %v4168_v9 = vld [vmem:[#allocation23_spill] sm:$0xff] }
 0x1b3   : > { %v1843_v58 = vsel %vm1825_vm7, %v1810_v11, %v1534_v54  ;;  %v1248_v37 = vpop.permute.xlu0 %1247  ;;  %v1663_v11 = vsel %vm1660_vm3, %v1630_v24, %v3202_v39 }
 0x1b4   : > { %1291 = vrot.lane.b32.xlu1 %v4159_v46, %s2478_s21  ;;  %2394 = vmatmul.mubr.msk.f32.vlgmr.msra.gmra.mxu1 %vm1863_vm9, %v1843_v58 }
 0x1b5   : > { %1387 = vrot.lane.b32.xlu0 %v515_v34, %s2479_s26  ;;  %v548_v34 = vld [vmem:[#allocation2 + $0xd1] sm:$0xff] }
 0x1b6   : > { %v3493_v63 = vpop.permute.xlu1 %1153 }
 0x1b7   : > { %v1250_v62 = vpop.permute.xlu0 %1249 }
 0x1b8   : > { %1293 = vrot.lane.b32.xlu1 %v3074_v16, %s2478_s21  ;;  %v1613_v16 = vsel %vm176_vm0, %v4161_v45, %v4160_v59 }
 0x1b9   : > { %1039 = vrot.lane.b32.xlu0 %v436_v29, %s2476_s19  ;;  %v1646_v18 = vsel %vm1627_vm2, %v1613_v16, %v3129_v14 }
 0x1ba   : > { %v1280_v1 = vpop.permute.xlu1 %1279  ;;  %v1679_v44 = vsel %vm1660_vm3, %v1646_v18, %v3272_v49  ;;  %v1696_v49 = vsel %vm1693_vm4, %v1663_v11, %v3334_v4 }
 0x1bb   : > { %v1376_v8 = vpop.permute.xlu0 %1375  ;;  %v1712_v38 = vsel %vm1693_vm4, %v1679_v44, %v3413_v25  ;;  %v1729_v46 = vsel %vm1726_vm5, %v1696_v49, %v3452_v19  ;;  %v4169_v44 = vld [vmem:[#allocation30_spill] sm:$0xff] }
 0x1bc   : > { %1419 = vrot.lane.b32.xlu1 %v436_v29, %s2479_s26  ;;  %v1745_v14 = vsel %vm1726_vm5, %v1712_v38, %v1152_v52  ;;  %v1762_v39 = vsel %vm1759_vm6, %v1729_v46, %v1248_v37 }
 0x1bd   : > { %1421 = vrot.lane.b32.xlu0 %v532_v57, %s2479_s26  ;;  %v1778_v58 = vsel %vm1759_vm6, %v1745_v14, %v1280_v1  ;;  %v1795_v4 = vsel %vm1792_vm8, %v1762_v39, %v1376_v8  ;;  %v4167_v1 = vld [vmem:[#allocation43_spill] sm:$0xff]  ;;  %v486_v14 = vld [vmem:[#allocation2 + $0xef] sm:$0xff] }
 0x1be   : > { %v1282_v30 = vpop.permute.xlu1 %1281 }
 0x1bf   : > { %v3500_v2 = vpop.permute.xlu0 %1027 }
 0x1c0   : > { %1389 = vrot.lane.b32.xlu1 %v516_v55, %s2479_s26  ;;  %v4165_v55 = vld [vmem:[#allocation6_spill] sm:$0xff] }
 0x1c1   : > { %1547 = vrot.lane.b32.xlu0 %v563_v35, %s2480_s5 }
 0x1c2   : > { %v1408_v47 = vpop.permute.xlu1 %1407 }
 0x1c3   : > { %v1410_v21 = vpop.permute.xlu0 %1409  ;;  %v1811_v29 = vsel %vm1792_vm8, %v1778_v58, %v1408_v47  ;;  %v564_v47 = vld [vmem:[#allocation2 + $0x1d1] sm:$0xff]  ;;  %v501_v58 = vld [vmem:[#allocation2 + $0x1e7] sm:$0xff] }
 0x1c4   : > { %1515 = vrot.lane.b32.xlu1 %v547_v7, %s2480_s5 }
 0x1c5   : > { %1135 = vrot.lane.b32.xlu0 %v547_v7, %s2477_s20  ;;  %v4166_v7 = vld [vmem:[#allocation12_spill] sm:$0xff] }
 0x1c6   : > { %v1378_v54 = vpop.permute.xlu1 %1377  ;;  %v1598_v59 = vsel %vm176_vm0, %v4166_v7, %v4165_v55  ;;  %v518_v7 = vld [vmem:[#allocation2 + $0xf0] sm:$0xff] }
 0x1c7   : > { %v1536_v25 = vpop.permute.xlu0 %1535  ;;  %v1631_v45 = vsel %vm1627_vm2, %v1598_v59, %v4167_v1  ;;  %v549_v1 = vld [vmem:[#allocation2 + $0xe9] sm:$0xff] }
 0x1c8   : > { %1041 = vrot.lane.b32.xlu1 %v532_v57, %s2476_s19  ;;  %v1844_v52 = vsel %vm1825_vm7, %v1811_v29, %v1536_v25  ;;  %v1664_v37 = vsel %vm1660_vm3, %v1631_v45, %v3222_v27  ;;  %v485_v27 = vld [vmem:[#allocation2 + $0xe7] sm:$0xff]  ;;  %v4170_v45 = vld [vmem:[#allocation22_spill] sm:$0xff] }
 0x1c9   : > { %1517 = vrot.lane.b32.xlu0 %v548_v34, %s2480_s5  ;;  %2396 = vmatprep.mubr.msk.f32.mxu1 %vm1863_vm9, %v1844_v52  ;;  %v1697_v8 = vsel %vm1693_vm4, %v1664_v37, %v3347_v15  ;;  %v517_v29 = vld [vmem:[#allocation2 + $0xe8] sm:$0xff]  ;;  %v534_v52 = vld [vmem:[#allocation2 + $0x1f0] sm:$0xff] }
 0x1ca   : > { %v1504_v19 = vpop.permute.xlu1 %1503  ;;  %v1730_v18 = vsel %vm1726_vm5, %v1697_v8, %v3481_v60 }
 0x1cb   : > { %v1828_v57 = vsel %vm1825_vm7, %v1795_v4, %v1504_v19  ;;  %v3543_v16 = vpop.permute.xlu0 %1123  ;;  %v1763_v26 = vsel %vm1759_vm6, %v1730_v18, %v1250_v62  ;;  %v565_v4 = vld [vmem:[#allocation2 + $0x1e9] sm:$0xff] }
 0x1cc   : > { %1167 = vrot.lane.b32.xlu1 %v563_v35, %s2477_s20  ;;  %2372 = vmatprep.mubr.msk.f32.mxu0 %vm1863_vm9, %v1828_v57  ;;  %v1614_v35 = vsel %vm176_vm0, %v4169_v44, %v4168_v9  ;;  %v1796_v33 = vsel %vm1792_vm8, %v1763_v26, %v1378_v54  ;;  %v1615_v57 = vsel %vm176_vm0, %v3011_v56, %v4170_v45  ;;  %v4172_v9 = vld [vmem:[#allocation42_spill] sm:$0xff] }
 0x1cd   : > { %1137 = vrot.lane.b32.xlu0 %v548_v34, %s2477_s20  ;;  %v1647_v15 = vsel %vm1627_vm2, %v1614_v35, %v3143_v41  ;;  %v1648_v8 = vsel %vm1627_vm2, %v1615_v57, %v3137_v40  ;;  %v519_v57 = vld [vmem:[#allocation2 + $0x108] sm:$0xff] }
 0x1ce   : > { %v3552_v5 = vpop.permute.xlu1 %1029  ;;  %v1680_v38 = vsel %vm1660_vm3, %v1647_v15, %v3285_v23  ;;  %v1681_v26 = vsel %vm1660_vm3, %v1648_v8, %v3279_v53 }
 0x1cf   : > { %v1506_v24 = vpop.permute.xlu0 %1505  ;;  %v1713_v11 = vsel %vm1693_vm4, %v1680_v38, %v3461_v3  ;;  %v1714_v56 = vsel %vm1693_vm4, %v1681_v26, %v3500_v2 }
 0x1d0   : > { %1549 = vrot.lane.b32.xlu1 %v564_v47, %s2480_s5  ;;  %v1829_v60 = vsel %vm1825_vm7, %v1796_v33, %v1506_v24  ;;  %v1746_v54 = vsel %vm1726_vm5, %v1713_v11, %v3493_v63  ;;  %v502_v63 = vld [vmem:[#allocation2 + $0x1ef] sm:$0xff] }
 0x1d1   : > { %1263 = vrot.lane.b32.xlu0 %v485_v27, %s2478_s21  ;;  %2373 = vmatmul.mubr.msk.f32.gmra.mxu0 %vm1863_vm9, %v1829_v60  ;;  %v1779_v41 = vsel %vm1759_vm6, %v1746_v54, %v1282_v30  ;;  %v438_v30 = vld [vmem:[#allocation2 + $0x1e8] sm:$0xff]  ;;  %v550_v24 = vld [vmem:[#allocation2 + $0xf1] sm:$0xff] }
 0x1d2   : > { %v1156_v62 = vpop.permute.xlu1 %1155  ;;  %v1812_v23 = vsel %vm1792_vm8, %v1779_v41, %v1410_v21 }
 0x1d3   : > { %v3571_v49 = vpop.permute.xlu0 %1125  ;;  %v1747_v40 = vsel %vm1726_vm5, %v1714_v56, %v1156_v62  ;;  %v4173_v62 = vld [vmem:[#allocation9_spill] sm:$0xff] }
 0x1d4   : > { %1169 = vrot.lane.b32.xlu1 %v564_v47, %s2477_s20  ;;  %v4171_v47 = vld [vmem:[#allocation5_spill] sm:$0xff]  ;;  %v1600_v11 = vsel %vm176_vm0, %v2945_v13, %v4173_v62 }
 0x1d5   : > { %1265 = vrot.lane.b32.xlu0 %v486_v14, %s2478_s21  ;;  %v1599_v18 = vsel %vm176_vm0, %v2927_v0, %v4171_v47  ;;  %v1633_v14 = vsel %vm1627_vm2, %v1600_v11, %v3088_v10 }
 0x1d6   : > { %v1538_v34 = vpop.permute.xlu1 %1537  ;;  %v1632_v44 = vsel %vm1627_vm2, %v1599_v18, %v4172_v9  ;;  %v1666_v41 = vsel %vm1660_vm3, %v1633_v14, %v3230_v50  ;;  %v487_v50 = vld [vmem:[#allocation2 + $0x107] sm:$0xff]  ;;  %v536_v18 = vld [vmem:[#allocation2 + $0x210] sm:$0xff] }
 0x1d7   : > { %v1845_v46 = vsel %vm1825_vm7, %v1812_v23, %v1538_v34  ;;  %v1252_v3 = vpop.permute.xlu0 %1251  ;;  %v1665_v35 = vsel %vm1660_vm3, %v1632_v44, %v3216_v51  ;;  %v1699_v13 = vsel %vm1693_vm4, %v1666_v41, %v3354_v28  ;;  %v566_v23 = vld [vmem:[#allocation2 + $0x1f1] sm:$0xff]  ;;  %v567_v44 = vld [vmem:[#allocation2 + $0x209] sm:$0xff] }
 0x1d8   : > { %1295 = vrot.lane.b32.xlu1 %v501_v58, %s2478_s21  ;;  %2397 = vmatmul.mubr.msk.f32.gmra.mxu1 %vm1863_vm9, %v1845_v46  ;;  %v1698_v53 = vsel %vm1693_vm4, %v1665_v35, %v3342_v31  ;;  %v1732_v34 = vsel %vm1726_vm5, %v1699_v13, %v3571_v49  ;;  %v551_v35 = vld [vmem:[#allocation2 + $0x109] sm:$0xff] }
 0x1d9   : > { %1391 = vrot.lane.b32.xlu0 %v517_v29, %s2479_s26  ;;  %v1731_v15 = vsel %vm1726_vm5, %v1698_v53, %v3543_v16  ;;  %v4174_v29 = vld [vmem:[#allocation26_spill] sm:$0xff] }
 0x1da   : > { %v3581_v25 = vpop.permute.xlu1 %1157  ;;  %v1764_v51 = vsel %vm1759_vm6, %v1731_v15, %v1252_v3  ;;  %v1616_v3 = vsel %vm176_vm0, %v3029_v61, %v4174_v29  ;;  %v2445_v15 = vld [vmem:[#allocation2 + $0x67] sm:$0xff] }
 0x1db   : > { %v1254_v39 = vpop.permute.xlu0 %1253  ;;  %v1649_v28 = vsel %vm1627_vm2, %v1616_v3, %v3151_v43 }
 0x1dc   : > { %1297 = vrot.lane.b32.xlu1 %v502_v63, %s2478_s21  ;;  %v1765_v46 = vsel %vm1759_vm6, %v1732_v34, %v1254_v39  ;;  %v4177_v34 = vld [vmem:[#allocation11_spill] sm:$0xff] }
 0x1dd   : > { %1043 = vrot.lane.b32.xlu0 %v438_v30, %s2476_s19 }
 0x1de   : > { %v1284_v21 = vpop.permute.xlu1 %1283 }
 0x1df   : > { %v1380_v55 = vpop.permute.xlu0 %1379  ;;  %v1780_v33 = vsel %vm1759_vm6, %v1747_v40, %v1284_v21  ;;  %v1682_v21 = vsel %vm1660_vm3, %v1649_v28, %v3293_v20  ;;  %v2444_v40 = vld [vmem:[#allocation2 + $0x167] sm:$0xff]  ;;  %v568_v28 = vld [vmem:[#allocation2 + $0x211] sm:$0xff] }
 0x1e0   : > { %1423 = vrot.lane.b32.xlu1 %v438_v30, %s2479_s26  ;;  %v1797_v31 = vsel %vm1792_vm8, %v1764_v51, %v1380_v55  ;;  %v1715_v61 = vsel %vm1693_vm4, %v1682_v21, %v3552_v5 }
 0x1e1   : > { %1425 = vrot.lane.b32.xlu0 %v534_v52, %s2479_s26  ;;  %v1748_v55 = vsel %vm1726_vm5, %v1715_v61, %v3581_v25  ;;  %v504_v25 = vld [vmem:[#allocation2 + $0x20f] sm:$0xff] }
 0x1e2   : > { %v1286_v59 = vpop.permute.xlu1 %1285  ;;  %v4178_v61 = vld [vmem:[#allocation29_spill] sm:$0xff] }
 0x1e3   : > { %v3587_v19 = vpop.permute.xlu0 %1031  ;;  %v1781_v43 = vsel %vm1759_vm6, %v1748_v55, %v1286_v59  ;;  %v440_v59 = vld [vmem:[#allocation2 + $0x208] sm:$0xff] }
 0x1e4   : > { %1393 = vrot.lane.b32.xlu1 %v518_v7, %s2479_s26 }
 0x1e5   : > { %1551 = vrot.lane.b32.xlu0 %v565_v4, %s2480_s5 }
 0x1e6   : > { %v1412_v37 = vpop.permute.xlu1 %1411 }
 0x1e7   : > { %v1414_v27 = vpop.permute.xlu0 %1413  ;;  %v1813_v60 = vsel %vm1792_vm8, %v1780_v33, %v1412_v37 }
 0x1e8   : > { %1519 = vrot.lane.b32.xlu1 %v549_v1, %s2480_s5  ;;  %v1814_v20 = vsel %vm1792_vm8, %v1781_v43, %v1414_v27  ;;  %v520_v27 = vld [vmem:[#allocation2 + $0x110] sm:$0xff] }
 0x1e9   : > { %1139 = vrot.lane.b32.xlu0 %v549_v1, %s2477_s20 }
 0x1ea   : > { %v1382_v0 = vpop.permute.xlu1 %1381 }
 0x1eb   : > { %v1540_v2 = vpop.permute.xlu0 %1539  ;;  %v1798_v63 = vsel %vm1792_vm8, %v1765_v46, %v1382_v0  ;;  %v4175_v0 = vld [vmem:[#allocation24_spill] sm:$0xff] }
 0x1ec   : > { %1045 = vrot.lane.b32.xlu1 %v534_v52, %s2476_s19  ;;  %v1846_v38 = vsel %vm1825_vm7, %v1813_v60, %v1540_v2  ;;  %v488_v52 = vld [vmem:[#allocation2 + $0x10f] sm:$0xff]  ;;  %v1617_v53 = vsel %vm176_vm0, %v2444_v40, %v4175_v0  ;;  %v4176_v60 = vld [vmem:[#allocation7_spill] sm:$0xff] }
 0x1ed   : > { %1521 = vrot.lane.b32.xlu0 %v550_v24, %s2480_s5  ;;  %2399 = vmatprep.mubr.msk.f32.mxu1 %vm1863_vm9, %v1846_v38  ;;  %v1601_v2 = vsel %vm176_vm0, %v2445_v15, %v4176_v60  ;;  %v537_v0 = vld [vmem:[#allocation2 + $0x228] sm:$0xff]  ;;  %v538_v15 = vld [vmem:[#allocation2 + $0x230] sm:$0xff] }
 0x1ee   : > { %v1508_v16 = vpop.permute.xlu1 %1507  ;;  %v1634_v62 = vsel %vm1627_vm2, %v1601_v2, %v3083_v12  ;;  %v554_v2 = vld [vmem:[#allocation2 + $0x131] sm:$0xff] }
 0x1ef   : > { %v1830_v54 = vsel %vm1825_vm7, %v1797_v31, %v1508_v16  ;;  %v3630_v58 = vpop.permute.xlu0 %1127  ;;  %v1667_v31 = vsel %vm1660_vm3, %v1634_v62, %v3224_v48  ;;  %v2448_v62 = vld [vmem:[#allocation2 + $0x187] sm:$0xff] }
 0x1f0   : > { %1171 = vrot.lane.b32.xlu1 %v565_v4, %s2477_s20  ;;  %2375 = vmatprep.mubr.msk.f32.mxu0 %vm1863_vm9, %v1830_v54  ;;  %v503_v4 = vld [vmem:[#allocation2 + $0x207] sm:$0xff]  ;;  %v552_v54 = vld [vmem:[#allocation2 + $0x111] sm:$0xff] }
 0x1f1   : > { %1141 = vrot.lane.b32.xlu0 %v550_v24, %s2477_s20  ;;  %v1650_v24 = vsel %vm1627_vm2, %v1617_v53, %v3145_v42 }
 0x1f2   : > { %v3639_v10 = vpop.permute.xlu1 %1033  ;;  %v1683_v51 = vsel %vm1660_vm3, %v1650_v24, %v3287_v17  ;;  %v1700_v17 = vsel %vm1693_vm4, %v1667_v31, %v3349_v6 }
 0x1f3   : > { %v1510_v30 = vpop.permute.xlu0 %1509  ;;  %v1716_v11 = vsel %vm1693_vm4, %v1683_v51, %v3587_v19  ;;  %v1733_v12 = vsel %vm1726_vm5, %v1700_v17, %v3630_v58 }
 0x1f4   : > { %1553 = vrot.lane.b32.xlu1 %v566_v23, %s2480_s5  ;;  %v1831_v49 = vsel %vm1825_vm7, %v1798_v63, %v1510_v30 }
 0x1f5   : > { %1267 = vrot.lane.b32.xlu0 %v487_v50, %s2478_s21  ;;  %2376 = vmatmul.mubr.msk.f32.gmra.mxu0 %vm1863_vm9, %v1831_v49 }
 0x1f6   : > { %v1160_v39 = vpop.permute.xlu1 %1159 }
 0x1f7   : > { %v3658_v7 = vpop.permute.xlu0 %1129  ;;  %v1749_v42 = vsel %vm1726_vm5, %v1716_v11, %v1160_v39  ;;  %v2447_v39 = vld [vmem:[#allocation2 + $0x16f] sm:$0xff] }
 0x1f8   : > { %1173 = vrot.lane.b32.xlu1 %v566_v23, %s2477_s20  ;;  %v2446_v23 = vld [vmem:[#allocation2 + $0x6f] sm:$0xff] }
 0x1f9   : > { %1269 = vrot.lane.b32.xlu0 %v488_v52, %s2478_s21  ;;  %v1602_v46 = vsel %vm176_vm0, %v2446_v23, %v4177_v34  ;;  %v1618_v52 = vsel %vm176_vm0, %v2447_v39, %v4178_v61  ;;  %v4181_v11 = vld [vmem:[#allocation28_spill] sm:$0xff] }
 0x1fa   : > { %v1542_v1 = vpop.permute.xlu1 %1541  ;;  %v1635_v50 = vsel %vm1627_vm2, %v1602_v46, %v3095_v36  ;;  %v1619_v31 = vsel %vm176_vm0, %v2448_v62, %v4181_v11  ;;  %v570_v46 = vld [vmem:[#allocation2 + $0x231] sm:$0xff] }
 0x1fb   : > { %v1847_v45 = vsel %vm1825_vm7, %v1814_v20, %v1542_v1  ;;  %v1256_v5 = vpop.permute.xlu0 %1255  ;;  %v1668_v3 = vsel %vm1660_vm3, %v1635_v50, %v3238_v32  ;;  %v489_v32 = vld [vmem:[#allocation2 + $0x127] sm:$0xff]  ;;  %v4180_v20 = vld [vmem:[#allocation70_spill] sm:$0xff]  ;;  %v2450_v61 = vld [vmem:[#allocation2 + $0x8f] sm:$0xff] }
 0x1fc   : > { %1299 = vrot.lane.b32.xlu1 %v503_v4, %s2478_s21  ;;  %2400 = vmatmul.mubr.msk.f32.gmra.mxu1 %vm1863_vm9, %v1847_v45  ;;  %v1766_v48 = vsel %vm1759_vm6, %v1733_v12, %v1256_v5  ;;  %v1701_v30 = vsel %vm1693_vm4, %v1668_v3, %v3360_v22  ;;  %v4179_v22 = vld [vmem:[#allocation53_spill] sm:$0xff]  ;;  %v4187_v3 = vld [vmem:[#allocation78_spill] sm:$0xff] }
 0x1fd   : > { %1395 = vrot.lane.b32.xlu0 %v519_v57, %s2479_s26  ;;  %v1734_v49 = vsel %vm1726_vm5, %v1701_v30, %v3658_v7  ;;  %v1651_v4 = vsel %vm1627_vm2, %v1618_v52, %v4179_v22  ;;  %v490_v5 = vld [vmem:[#allocation2 + $0x12f] sm:$0xff]  ;;  %v4188_v52 = vld [vmem:[#allocation14_spill] sm:$0xff] }
 0x1fe   : > { %v3668_v37 = vpop.permute.xlu1 %1161  ;;  %v1684_v1 = vsel %vm1660_vm3, %v1651_v4, %v4180_v20  ;;  %v4189_v4 = vld [vmem:[#allocation46_spill] sm:$0xff]  ;;  %v4190_v20 = vld [vmem:[#allocation63_spill] sm:$0xff] }
 0x1ff   : > { %v1258_v8 = vpop.permute.xlu0 %1257  ;;  %v1717_v57 = vsel %vm1693_vm4, %v1684_v1, %v3639_v10  ;;  %v521_v10 = vld [vmem:[#allocation2 + $0x128] sm:$0xff] }
 0x200   : > { %1301 = vrot.lane.b32.xlu1 %v504_v25, %s2478_s21  ;;  %v1767_v21 = vsel %vm1759_vm6, %v1734_v49, %v1258_v8  ;;  %v1750_v25 = vsel %vm1726_vm5, %v1717_v57, %v3668_v37  ;;  %v506_v37 = vld [vmem:[#allocation2 + $0x22f] sm:$0xff] }
 0x201   : > { %1047 = vrot.lane.b32.xlu0 %v440_v59, %s2476_s19  ;;  %v4191_v57 = vld [vmem:[#allocation80_spill] sm:$0xff] }
 0x202   : > { %v1288_v47 = vpop.permute.xlu1 %1287 }
 0x203   : > { %v1384_v26 = vpop.permute.xlu0 %1383  ;;  %v1782_v14 = vsel %vm1759_vm6, %v1749_v42, %v1288_v47  ;;  %v505_v47 = vld [vmem:[#allocation2 + $0x227] sm:$0xff] }
 0x204   : > { %1427 = vrot.lane.b32.xlu1 %v440_v59, %s2479_s26  ;;  %v1799_v6 = vsel %vm1792_vm8, %v1766_v48, %v1384_v26 }
 0x205   : > { %1429 = vrot.lane.b32.xlu0 %v536_v18, %s2479_s26 }
 0x206   : > { %v3674_v9 = vpop.permute.xlu1 %1289 }
 0x207   : > { %v3676_v56 = vpop.permute.xlu0 %1035  ;;  %v1783_v8 = vsel %vm1759_vm6, %v1750_v25, %v3674_v9  ;;  %v522_v9 = vld [vmem:[#allocation2 + $0x130] sm:$0xff] }
 0x208   : > { %1397 = vrot.lane.b32.xlu1 %v520_v27, %s2479_s26 }
 0x209   : > { %1555 = vrot.lane.b32.xlu0 %v567_v44, %s2480_s5 }
 0x20a   : > { %v1416_v33 = vpop.permute.xlu1 %1415 }
 0x20b   : > { %v1418_v38 = vpop.permute.xlu0 %1417  ;;  %v1815_v41 = vsel %vm1792_vm8, %v1782_v14, %v1416_v33  ;;  %v553_v33 = vld [vmem:[#allocation2 + $0x129] sm:$0xff] }
 0x20c   : > { %1523 = vrot.lane.b32.xlu1 %v551_v35, %s2480_s5  ;;  %v2449_v14 = vld [vmem:[#allocation2 + $0x87] sm:$0xff] }
 0x20d   : > { %1143 = vrot.lane.b32.xlu0 %v551_v35, %s2477_s20 }
 0x20e   : > { %v1386_v16 = vpop.permute.xlu1 %1385 }
 0x20f   : > { %v1544_v19 = vpop.permute.xlu0 %1543  ;;  %v1800_v55 = vsel %vm1792_vm8, %v1767_v21, %v1386_v16  ;;  %v4182_v16 = vld [vmem:[#allocation52_spill] sm:$0xff] }
 0x210   : > { %1049 = vrot.lane.b32.xlu1 %v536_v18, %s2476_s19  ;;  %v1848_v13 = vsel %vm1825_vm7, %v1815_v41, %v1544_v19  ;;  %v1816_v18 = vsel %vm1792_vm8, %v1783_v8, %v1418_v38  ;;  %v569_v38 = vld [vmem:[#allocation2 + $0x229] sm:$0xff]  ;;  %v1652_v17 = vsel %vm1627_vm2, %v1619_v31, %v4182_v16 }
 0x211   : > { %1525 = vrot.lane.b32.xlu0 %v552_v54, %s2480_s5  ;;  %2402 = vmatprep.mubr.msk.f32.mxu1 %vm1863_vm9, %v1848_v13  ;;  %v4184_v41 = vld [vmem:[#allocation69_spill] sm:$0xff]  ;;  %v4185_v13 = vld [vmem:[#allocation44_spill] sm:$0xff] }
 0x212   : > { %v1512_v58 = vpop.permute.xlu1 %1511  ;;  %v1685_v19 = vsel %vm1660_vm3, %v1652_v17, %v4184_v41 }
 0x213   : > { %v1832_v29 = vsel %vm1825_vm7, %v1799_v6, %v1512_v58  ;;  %v3716_v63 = vpop.permute.xlu0 %1131  ;;  %v1718_v34 = vsel %vm1693_vm4, %v1685_v19, %v3676_v56  ;;  %v4186_v6 = vld [vmem:[#allocation61_spill] sm:$0xff]  ;;  %v4196_v19 = vld [vmem:[#allocation54_spill] sm:$0xff] }
 0x214   : > { %1175 = vrot.lane.b32.xlu1 %v567_v44, %s2477_s20  ;;  %2378 = vmatprep.mubr.msk.f32.mxu0 %vm1863_vm9, %v1832_v29 }
 0x215   : > { %1145 = vrot.lane.b32.xlu0 %v552_v54, %s2477_s20  ;;  %v4183_v54 = vld [vmem:[#allocation10_spill] sm:$0xff] }
 0x216   : > { %v3725_v36 = vpop.permute.xlu1 %1037  ;;  %v1603_v12 = vsel %vm176_vm0, %v2449_v14, %v4183_v54 }
 0x217   : > { %v1514_v43 = vpop.permute.xlu0 %1513  ;;  %v1636_v23 = vsel %vm1627_vm2, %v1603_v12, %v4185_v13  ;;  %v2452_v12 = vld [vmem:[#allocation2 + $0x1a7] sm:$0xff] }
 0x218   : > { %1557 = vrot.lane.b32.xlu1 %v568_v28, %s2480_s5  ;;  %v1833_v7 = vsel %vm1825_vm7, %v1800_v55, %v1514_v43  ;;  %v1669_v58 = vsel %vm1660_vm3, %v1636_v23, %v4186_v6  ;;  %v1604_v55 = vsel %vm176_vm0, %v2450_v61, %v4188_v52  ;;  %v2453_v13 = vld [vmem:[#allocation2 + $0xa7] sm:$0xff]  ;;  %v4197_v23 = vld [vmem:[#allocation13_spill] sm:$0xff] }
 0x219   : > { %1271 = vrot.lane.b32.xlu0 %v489_v32, %s2478_s21  ;;  %2379 = vmatmul.mubr.msk.f32.gmra.mxu0 %vm1863_vm9, %v1833_v7  ;;  %v1702_v30 = vsel %vm1693_vm4, %v1669_v58, %v4187_v3 }
 0x21a   : > { %v1164_v45 = vpop.permute.xlu1 %1163  ;;  %v1735_v49 = vsel %vm1726_vm5, %v1702_v30, %v3716_v63  ;;  %v1637_v63 = vsel %vm1627_vm2, %v1604_v55, %v4189_v4  ;;  %v4200_v30 = vld [vmem:[#allocation62_spill] sm:$0xff]  ;;  %v4202_v4 = vld [vmem:[#allocation16_spill] sm:$0xff] }
 0x21b   : > { %v3743_v59 = vpop.permute.xlu0 %1133  ;;  %v1751_v50 = vsel %vm1726_vm5, %v1718_v34, %v1164_v45  ;;  %v1670_v1 = vsel %vm1660_vm3, %v1637_v63, %v4190_v20  ;;  %v1605_v34 = vsel %vm176_vm0, %v2453_v13, %v4197_v23 }
 0x21c   : > { %1177 = vrot.lane.b32.xlu1 %v568_v28, %s2477_s20 }
 0x21d   : > { %1273 = vrot.lane.b32.xlu0 %v490_v5, %s2478_s21  ;;  %v1703_v5 = vsel %vm1693_vm4, %v1670_v1, %v4191_v57  ;;  %v4203_v1 = vld [vmem:[#allocation48_spill] sm:$0xff] }
 0x21e   : > { %v1546_v26 = vpop.permute.xlu1 %1545  ;;  %v1736_v25 = vsel %vm1726_vm5, %v1703_v5, %v3743_v59  ;;  %v4204_v5 = vld [vmem:[#allocation65_spill] sm:$0xff] }
 0x21f   : > { %v1849_v27 = vsel %vm1825_vm7, %v1816_v18, %v1546_v26  ;;  %v1260_v44 = vpop.permute.xlu0 %1259  ;;  %v2451_v18 = vld [vmem:[#allocation2 + $0x18f] sm:$0xff] }
 0x220   : > { %1303 = vrot.lane.b32.xlu1 %v505_v47, %s2478_s21  ;;  %2403 = vmatmul.mubr.msk.f32.gmra.mxu1 %vm1863_vm9, %v1849_v27  ;;  %v1768_v56 = vsel %vm1759_vm6, %v1735_v49, %v1260_v44  ;;  %v4192_v26 = vld [vmem:[#allocation32_spill] sm:$0xff] }
 0x221   : > { %1399 = vrot.lane.b32.xlu0 %v521_v10, %s2479_s26  ;;  %v1620_v27 = vsel %vm176_vm0, %v2451_v18, %v4192_v26  ;;  %v4205_v18 = vld [vmem:[#allocation82_spill] sm:$0xff] }
 0x222   : > { %v3754_v35 = vpop.permute.xlu1 %1165 }
 0x223   : > { %v1262_v40 = vpop.permute.xlu0 %1261 }
 0x224   : > { %1305 = vrot.lane.b32.xlu1 %v506_v37, %s2478_s21  ;;  %v1769_v47 = vsel %vm1759_vm6, %v1736_v25, %v1262_v40  ;;  %v4193_v37 = vld [vmem:[#allocation55_spill] sm:$0xff] }
 0x225   : > { %1401 = vrot.lane.b32.xlu0 %v522_v9, %s2479_s26  ;;  %v1653_v9 = vsel %vm1627_vm2, %v1620_v27, %v4193_v37  ;;  %v2455_v37 = vld [vmem:[#allocation2 + $0x1af] sm:$0xff] }
 0x226   : > { %v1292_v53 = vpop.permute.xlu1 %1291 }
 0x227   : > { %v1388_v24 = vpop.permute.xlu0 %1387  ;;  %v1784_v28 = vsel %vm1759_vm6, %v1751_v50, %v1292_v53  ;;  %v4194_v53 = vld [vmem:[#allocation72_spill] sm:$0xff]  ;;  %v4199_v50 = vld [vmem:[#allocation45_spill] sm:$0xff] }
 0x228   : > { %1431 = vrot.lane.b32.xlu1 %v537_v0, %s2479_s26  ;;  %v1801_v43 = vsel %vm1792_vm8, %v1768_v56, %v1388_v24 }
 0x229   : > { %1527 = vrot.lane.b32.xlu0 %v553_v33, %s2480_s5  ;;  %v1686_v33 = vsel %vm1660_vm3, %v1653_v9, %v4194_v53  ;;  %v4206_v9 = vld [vmem:[#allocation34_spill] sm:$0xff] }
 0x22a   : > { %v1294_v60 = vpop.permute.xlu1 %1293  ;;  %v1719_v40 = vsel %vm1693_vm4, %v1686_v33, %v3725_v36 }
 0x22b   : > { %v3760_v51 = vpop.permute.xlu0 %1039  ;;  %v1752_v24 = vsel %vm1726_vm5, %v1719_v40, %v3754_v35  ;;  %v4195_v35 = vld [vmem:[#allocation31_spill] sm:$0xff] }
 0x22c   : > { %1433 = vrot.lane.b32.xlu1 %v538_v15, %s2479_s26  ;;  %v1621_v41 = vsel %vm176_vm0, %v2452_v12, %v4195_v35 }
 0x22d   : > { %1529 = vrot.lane.b32.xlu0 %v554_v2, %s2480_s5  ;;  %v1785_v2 = vsel %vm1759_vm6, %v1752_v24, %v1294_v60 }
 0x22e   : > { %v1420_v42 = vpop.permute.xlu1 %1419 }
 0x22f   : > { %v1422_v48 = vpop.permute.xlu0 %1421  ;;  %v1817_v21 = vsel %vm1792_vm8, %v1784_v28, %v1420_v42 }
 0x230   : > { %1559 = vrot.lane.b32.xlu1 %v569_v38, %s2480_s5  ;;  %v1818_v38 = vsel %vm1792_vm8, %v1785_v2, %v1422_v48  ;;  %v1654_v48 = vsel %vm1627_vm2, %v1621_v41, %v4196_v19  ;;  %v4208_v2 = vld [vmem:[#allocation74_spill] sm:$0xff] }
 0x232   : > { %v1390_v29 = vpop.permute.xlu1 %1389 }
 0x233   : > { %v1548_v32 = vpop.permute.xlu0 %1547  ;;  %v1802_v10 = vsel %vm1792_vm8, %v1769_v47, %v1390_v29  ;;  %v1638_v29 = vsel %vm1627_vm2, %v1605_v34, %v4199_v50  ;;  %v2456_v34 = vld [vmem:[#allocation2 + $0x1c7] sm:$0xff] }
 0x234   : > { %1561 = vrot.lane.b32.xlu1 %v570_v46, %s2480_s5  ;;  %v1850_v39 = vsel %vm1825_vm7, %v1817_v21, %v1548_v32  ;;  %v4198_v46 = vld [vmem:[#allocation71_spill] sm:$0xff]  ;;  %v1671_v28 = vsel %vm1660_vm3, %v1638_v29, %v4200_v30  ;;  %v4210_v29 = vld [vmem:[#allocation56_spill] sm:$0xff] }
 0x235   : > { %2405 = vmatprep.mubr.msk.f32.mxu1 %vm1863_vm9, %v1850_v39  ;;  %v1687_v6 = vsel %vm1660_vm3, %v1654_v48, %v4198_v46  ;;  %v4201_v32 = vld [vmem:[#allocation79_spill] sm:$0xff]  ;;  %v4209_v46 = vld [vmem:[#allocation33_spill] sm:$0xff] }
 0x236   : > { %v1516_v22 = vpop.permute.xlu1 %1515  ;;  %v1720_v3 = vsel %vm1693_vm4, %v1687_v6, %v3760_v51  ;;  %v1704_v56 = vsel %vm1693_vm4, %v1671_v28, %v4201_v32  ;;  %v1623_v6 = vsel %vm176_vm0, %v2456_v34, %v4209_v46  ;;  %v2457_v30 = vld [vmem:[#allocation2 + $0xc7] sm:$0xff] }
 0x237   : > { %v1834_v7 = vsel %vm1825_vm7, %v1801_v43, %v1516_v22  ;;  %v1136_v45 = vpop.permute.xlu0 %1135  ;;  %v2454_v22 = vld [vmem:[#allocation2 + $0xaf] sm:$0xff]  ;;  %v4211_v28 = vld [vmem:[#allocation15_spill] sm:$0xff] }
 0x238   : > { %2381 = vmatprep.mubr.msk.f32.mxu0 %vm1863_vm9, %v1834_v7  ;;  %v1737_v61 = vsel %vm1726_vm5, %v1704_v56, %v1136_v45  ;;  %v1606_v63 = vsel %vm176_vm0, %v2454_v22, %v4202_v4  ;;  %v4215_v4 = vld [vmem:[#allocation81_spill] sm:$0xff] }
 0x239   : > { %v1639_v57 = vsel %vm1627_vm2, %v1606_v63, %v4203_v1 }
 0x23a   : > { %v3803_v8 = vpop.permute.xlu1 %1041  ;;  %v1672_v25 = vsel %vm1660_vm3, %v1639_v57, %v4204_v5  ;;  %v2458_v5 = vld [vmem:[#allocation2 + $0xcf] sm:$0xff] }
 0x23b   : > { %v1518_v44 = vpop.permute.xlu0 %1517  ;;  %v1705_v26 = vsel %vm1693_vm4, %v1672_v25, %v4205_v18  ;;  %v4216_v25 = vld [vmem:[#allocation18_spill] sm:$0xff] }
 0x23c   : > { %v1835_v0 = vsel %vm1825_vm7, %v1802_v10, %v1518_v44  ;;  %v1608_v18 = vsel %vm176_vm0, %v2458_v5, %v4216_v25  ;;  %v4229_v5 = vld [vmem:[#allocation35_spill] sm:$0xff] }
 0x23d   : > { %2382 = vmatmul.mubr.msk.f32.gmra.mxu0 %vm1863_vm9, %v1835_v0  ;;  %v1622_v0 = vsel %vm176_vm0, %v2455_v37, %v4206_v9  ;;  %v4218_v9 = vld [vmem:[#allocation67_spill] sm:$0xff] }
 0x23e   : > { %v1168_v59 = vpop.permute.xlu1 %1167 }
 0x23f   : > { %v1138_v15 = vpop.permute.xlu0 %1137  ;;  %v1753_v49 = vsel %vm1726_vm5, %v1720_v3, %v1168_v59  ;;  %v4207_v59 = vld [vmem:[#allocation57_spill] sm:$0xff]  ;;  %v1656_v3 = vsel %vm1627_vm2, %v1623_v6, %v4210_v29 }
 0x240   : > { %v1738_v27 = vsel %vm1726_vm5, %v1705_v26, %v1138_v15  ;;  %v1655_v40 = vsel %vm1627_vm2, %v1622_v0, %v4207_v59 }
 0x241   : > { %v1688_v15 = vsel %vm1660_vm3, %v1655_v40, %v4208_v2 }
 0x242   : > { %v1550_v62 = vpop.permute.xlu1 %1549 }
 0x243   : > { %v1851_v11 = vsel %vm1825_vm7, %v1818_v38, %v1550_v62  ;;  %v1264_v31 = vpop.permute.xlu0 %1263  ;;  %v1721_v62 = vsel %vm1693_vm4, %v1688_v15, %v3803_v8  ;;  %v2459_v15 = vld [vmem:[#allocation2 + $0x1cf] sm:$0xff] }
 0x244   : > { %2406 = vmatmul.mubr.msk.f32.gmra.mxu1 %vm1863_vm9, %v1851_v11  ;;  %v1770_v43 = vsel %vm1759_vm6, %v1737_v61, %v1264_v31 }
 0x246   : > { %v1170_v42 = vpop.permute.xlu1 %1169 }
 0x247   : > { %v1266_v16 = vpop.permute.xlu0 %1265  ;;  %v1754_v11 = vsel %vm1726_vm5, %v1721_v62, %v1170_v42 }
 0x248   : > { %v1771_v44 = vsel %vm1759_vm6, %v1738_v27, %v1266_v16 }
 0x24a   : > { %v1296_v17 = vpop.permute.xlu1 %1295 }
 0x24b   : > { %v1392_v14 = vpop.permute.xlu0 %1391  ;;  %v1786_v39 = vsel %vm1759_vm6, %v1753_v49, %v1296_v17  ;;  %v1607_v49 = vsel %vm176_vm0, %v2457_v30, %v4211_v28  ;;  %v4223_v30 = vld [vmem:[#allocation17_spill] sm:$0xff] }
 0x24c   : > { %v1803_v7 = vsel %vm1792_vm8, %v1770_v43, %v1392_v14 }
 0x24e   : > { %v1298_v54 = vpop.permute.xlu1 %1297 }
 0x24f   : > { %v3823_v36 = vpop.permute.xlu0 %1043  ;;  %v1787_v16 = vsel %vm1759_vm6, %v1754_v11, %v1298_v54 }
 0x252   : > { %v1424_v60 = vpop.permute.xlu1 %1423 }
 0x253   : > { %v1426_v58 = vpop.permute.xlu0 %1425  ;;  %v1819_v52 = vsel %vm1792_vm8, %v1786_v39, %v1424_v60  ;;  %v4213_v39 = vld [vmem:[#allocation47_spill] sm:$0xff] }
 0x254   : > { %v1820_v17 = vsel %vm1792_vm8, %v1787_v16, %v1426_v58  ;;  %v1640_v61 = vsel %vm1627_vm2, %v1607_v49, %v4213_v39 }
 0x256   : > { %v1394_v21 = vpop.permute.xlu1 %1393 }
 0x257   : > { %v1552_v55 = vpop.permute.xlu0 %1551  ;;  %v1804_v53 = vsel %vm1792_vm8, %v1771_v44, %v1394_v21  ;;  %v4212_v21 = vld [vmem:[#allocation73_spill] sm:$0xff]  ;;  %v4217_v44 = vld [vmem:[#allocation50_spill] sm:$0xff] }
 0x258   : > { %v1852_v51 = vsel %vm1825_vm7, %v1819_v52, %v1552_v55  ;;  %v1689_v32 = vsel %vm1660_vm3, %v1656_v3, %v4212_v21  ;;  %v4214_v55 = vld [vmem:[#allocation64_spill] sm:$0xff]  ;;  %v1641_v37 = vsel %vm1627_vm2, %v1608_v18, %v4217_v44  ;;  %v4224_v21 = vld [vmem:[#allocation49_spill] sm:$0xff] }
 0x259   : > { %2408 = vmatprep.mubr.msk.f32.mxu1 %vm1863_vm9, %v1852_v51  ;;  %v1722_v52 = vsel %vm1693_vm4, %v1689_v32, %v3823_v36  ;;  %v1673_v43 = vsel %vm1660_vm3, %v1640_v61, %v4214_v55  ;;  %v1674_v0 = vsel %vm1660_vm3, %v1641_v37, %v4218_v9  ;;  %v4226_v55 = vld [vmem:[#allocation83_spill] sm:$0xff]  ;;  %v4230_v18 = vld [vmem:[#allocation68_spill] sm:$0xff]  ;;  %v4231_v37 = vld [vmem:[#allocation58_spill] sm:$0xff] }
 0x25a   : > { %v1520_v20 = vpop.permute.xlu1 %1519  ;;  %v1706_v63 = vsel %vm1693_vm4, %v1673_v43, %v4215_v4  ;;  %v4232_v9 = vld [vmem:[#allocation85_spill] sm:$0xff] }
 0x25b   : > { %v1836_v45 = vsel %vm1825_vm7, %v1803_v7, %v1520_v20  ;;  %v1140_v47 = vpop.permute.xlu0 %1139 }
 0x25c   : > { %2384 = vmatprep.mubr.msk.f32.mxu0 %vm1863_vm9, %v1836_v45  ;;  %v1739_v20 = vsel %vm1726_vm5, %v1706_v63, %v1140_v47 }
 0x25e   : > { %v3860_v10 = vpop.permute.xlu1 %1045 }
 0x25f   : > { %v1522_v33 = vpop.permute.xlu0 %1521 }
 0x260   : > { %v1837_v24 = vsel %vm1825_vm7, %v1804_v53, %v1522_v33  ;;  %v4219_v33 = vld [vmem:[#allocation84_spill] sm:$0xff] }
 0x261   : > { %2385 = vmatmul.mubr.msk.f32.gmra.mxu0 %vm1863_vm9, %v1837_v24  ;;  %v1707_v59 = vsel %vm1693_vm4, %v1674_v0, %v4219_v33  ;;  %v4233_v33 = vld [vmem:[#allocation75_spill] sm:$0xff] }
 0x262   : > { %v1172_v38 = vpop.permute.xlu1 %1171 }
 0x263   : > { %v1142_v31 = vpop.permute.xlu0 %1141  ;;  %v1755_v51 = vsel %vm1726_vm5, %v1722_v52, %v1172_v38  ;;  %v4220_v38 = vld [vmem:[#allocation36_spill] sm:$0xff] }
 0x264   : > { %v1740_v40 = vsel %vm1726_vm5, %v1707_v59, %v1142_v31  ;;  %v1624_v62 = vsel %vm176_vm0, %v2459_v15, %v4220_v38 }
 0x266   : > { %v1554_v14 = vpop.permute.xlu1 %1553 }
 0x267   : > { %v1853_v12 = vsel %vm1825_vm7, %v1820_v17, %v1554_v14  ;;  %v1268_v35 = vpop.permute.xlu0 %1267  ;;  %v4221_v17 = vld [vmem:[#allocation59_spill] sm:$0xff] }
 0x268   : > { %2409 = vmatmul.mubr.msk.f32.gmra.mxu1 %vm1863_vm9, %v1853_v12  ;;  %v1772_v45 = vsel %vm1759_vm6, %v1739_v20, %v1268_v35  ;;  %v1657_v14 = vsel %vm1627_vm2, %v1624_v62, %v4221_v17  ;;  %v4222_v35 = vld [vmem:[#allocation76_spill] sm:$0xff] }
 0x269   : > { %v2463_v62 = vld [vmem:[#allocation2 + $0x1ef] sm:$0xff] }
 0x26a   : > { %v1174_v41 = vpop.permute.xlu1 %1173 }
 0x26b   : > { %v1270_v60 = vpop.permute.xlu0 %1269 }
 0x26c   : > { %v1773_v2 = vsel %vm1759_vm6, %v1740_v40, %v1270_v60 }
 0x26d   : > { %v2371_v8 = vpop.f32.mrf.mxu0 }
 0x26e   : > { %v1300_v42 = vpop.permute.xlu1 %1299  ;;  %2190 = vst.msk [vmem:[%s3884_s8 + $0x8] sm:$0xff] %vm176_vm0, %v2371_v8  ;;  %v1690_v8 = vsel %vm1660_vm3, %v1657_v14, %v4222_v35  ;;  %v4235_v35 = vld [vmem:[#allocation60_spill] sm:$0xff] }
 0x26f   : > { %v1396_v54 = vpop.permute.xlu0 %1395  ;;  %v2030_v19 = vpop.f32.mrf.mxu0  ;;  %v1788_v7 = vsel %vm1759_vm6, %v1755_v51, %v1300_v42  ;;  %v1723_v60 = vsel %vm1693_vm4, %v1690_v8, %v3860_v10  ;;  %v2461_v51 = vld [vmem:[#allocation2 + $0xef] sm:$0xff] }
 0x270   : > { %2189 = vst.msk [vmem:[%s3884_s8] sm:$0xff] %vm176_vm0, %v2030_v19  ;;  %v1805_v26 = vsel %vm1792_vm8, %v1772_v45, %v1396_v54  ;;  %v1756_v42 = vsel %vm1726_vm5, %v1723_v60, %v1174_v41 }
 0x272   : > { %v1302_v48 = vpop.permute.xlu1 %1301 }
 0x273   : > { %v3890_v13 = vpop.permute.xlu0 %1047  ;;  %v1789_v19 = vsel %vm1759_vm6, %v1756_v42, %v1302_v48  ;;  %v2460_v48 = vld [vmem:[#allocation2 + $0xe7] sm:$0xff] }
 0x274   : > { %v2395_v23 = vpop.f32.mrf.mxu1  ;;  %v1609_v28 = vsel %vm176_vm0, %v2460_v48, %v4223_v30 }
 0x275   : > { %2206 = vst.msk [vmem:[%s3884_s8 + $0x88] sm:$0xff] %vm176_vm0, %v2395_v23  ;;  %v1642_v32 = vsel %vm1627_vm2, %v1609_v28, %v4224_v21 }
 0x276   : > { %v2110_v58 = vpop.f32.mrf.mxu1  ;;  %v1428_v50 = vpop.permute.xlu1 %1427 }
 0x277   : > { %2205 = vst.msk [vmem:[%s3884_s8 + $0x80] sm:$0xff] %vm176_vm0, %v2110_v58  ;;  %v1430_v56 = vpop.permute.xlu0 %1429  ;;  %v1821_v1 = vsel %vm1792_vm8, %v1788_v7, %v1428_v50 }
 0x278   : > { %v1822_v23 = vsel %vm1792_vm8, %v1789_v19, %v1430_v56  ;;  %v4225_v56 = vld [vmem:[#allocation66_spill] sm:$0xff] }
 0x279   : > { %v1675_v39 = vsel %vm1660_vm3, %v1642_v32, %v4225_v56 }
 0x27a   : > { %v1398_v22 = vpop.permute.xlu1 %1397  ;;  %v1708_v43 = vsel %vm1693_vm4, %v1675_v39, %v4226_v55 }
 0x27b   : > { %v1556_v57 = vpop.permute.xlu0 %1555  ;;  %v1806_v11 = vsel %vm1792_vm8, %v1773_v2, %v1398_v22  ;;  %v4227_v22 = vld [vmem:[#allocation19_spill] sm:$0xff] }
 0x27c   : > { %v1854_v36 = vsel %vm1825_vm7, %v1821_v1, %v1556_v57  ;;  %v1610_v4 = vsel %vm176_vm0, %v2461_v51, %v4227_v22  ;;  %v4228_v1 = vld [vmem:[#allocation51_spill] sm:$0xff] }
 0x27d   : > { %2411 = vmatprep.mubr.msk.f32.mxu1 %vm1863_vm9, %v1854_v36  ;;  %v1643_v57 = vsel %vm1627_vm2, %v1610_v4, %v4228_v1  ;;  %v2462_v36 = vld [vmem:[#allocation2 + $0x1e7] sm:$0xff] }
 0x27e   : > { %v1524_v27 = vpop.permute.xlu1 %1523  ;;  %v1625_v25 = vsel %vm176_vm0, %v2462_v36, %v4229_v5 }
 0x27f   : > { %v1838_v47 = vsel %vm1825_vm7, %v1805_v26, %v1524_v27  ;;  %v1144_v53 = vpop.permute.xlu0 %1143  ;;  %v1676_v26 = vsel %vm1660_vm3, %v1643_v57, %v4230_v18 }
 0x280   : > { %2387 = vmatprep.mubr.msk.f32.mxu0 %vm1863_vm9, %v1838_v47  ;;  %v1741_v63 = vsel %vm1726_vm5, %v1708_v43, %v1144_v53  ;;  %v1658_v47 = vsel %vm1627_vm2, %v1625_v25, %v4231_v37  ;;  %v1709_v0 = vsel %vm1693_vm4, %v1676_v26, %v4232_v9 }
 0x281   : > { %v1691_v59 = vsel %vm1660_vm3, %v1658_v47, %v4233_v33 }
 0x282   : > { %v3931_v24 = vpop.permute.xlu1 %1049  ;;  %v1724_v15 = vsel %vm1693_vm4, %v1691_v59, %v3890_v13  ;;  %v4236_v13 = vld [vmem:[#allocation77_spill] sm:$0xff] }
 0x283   : > { %v1526_v16 = vpop.permute.xlu0 %1525 }
 0x284   : > { %v1839_v12 = vsel %vm1825_vm7, %v1806_v11, %v1526_v16  ;;  %v4234_v11 = vld [vmem:[#allocation39_spill] sm:$0xff] }
 0x285   : > { %2388 = vmatmul.mubr.msk.f32.gmra.mxu0 %vm1863_vm9, %v1839_v12  ;;  %v1626_v16 = vsel %vm176_vm0, %v2463_v62, %v4234_v11 }
 0x286   : > { %v1176_v31 = vpop.permute.xlu1 %1175  ;;  %v1659_v8 = vsel %vm1627_vm2, %v1626_v16, %v4235_v35 }
 0x287   : > { %v1146_v54 = vpop.permute.xlu0 %1145  ;;  %v1757_v17 = vsel %vm1726_vm5, %v1724_v15, %v1176_v31 }
 0x288   : > { %v1742_v40 = vsel %vm1726_vm5, %v1709_v0, %v1146_v54  ;;  %v1692_v54 = vsel %vm1660_vm3, %v1659_v8, %v4236_v13 }
 0x289   : > { %v1725_v31 = vsel %vm1693_vm4, %v1692_v54, %v3931_v24 }
 0x28a   : > { %v1558_v34 = vpop.permute.xlu1 %1557 }
 0x28b   : > { %v1855_v46 = vsel %vm1825_vm7, %v1822_v23, %v1558_v34  ;;  %v1272_v6 = vpop.permute.xlu0 %1271 }
 0x28c   : > { %2412 = vmatmul.mubr.msk.f32.gmra.mxu1 %vm1863_vm9, %v1855_v46  ;;  %v1774_v45 = vsel %vm1759_vm6, %v1741_v63, %v1272_v6 }
 0x28e   : > { %v1178_v58 = vpop.permute.xlu1 %1177 }
 0x28f   : > { %v1274_v50 = vpop.permute.xlu0 %1273  ;;  %v1758_v46 = vsel %vm1726_vm5, %v1725_v31, %v1178_v58 }
 0x290   : > { %v1775_v38 = vsel %vm1759_vm6, %v1742_v40, %v1274_v50 }
 0x291   : > { %v2374_v3 = vpop.f32.mrf.mxu0 }
 0x292   : > { %v1304_v29 = vpop.permute.xlu1 %1303  ;;  %2192 = vst.msk [vmem:[%s3884_s8 + $0x18] sm:$0xff] %vm176_vm0, %v2374_v3 }
 0x293   : > { %v1400_v10 = vpop.permute.xlu0 %1399  ;;  %v2040_v41 = vpop.f32.mrf.mxu0  ;;  %v1790_v60 = vsel %vm1759_vm6, %v1757_v17, %v1304_v29 }
 0x294   : > { %2191 = vst.msk [vmem:[%s3884_s8 + $0x10] sm:$0xff] %vm176_vm0, %v2040_v41  ;;  %v1807_v27 = vsel %vm1792_vm8, %v1774_v45, %v1400_v10 }
 0x296   : > { %v1306_v49 = vpop.permute.xlu1 %1305 }
 0x297   : > { %v1402_v61 = vpop.permute.xlu0 %1401  ;;  %v1791_v6 = vsel %vm1759_vm6, %v1758_v46, %v1306_v49 }
 0x298   : > { %v2398_v52 = vpop.f32.mrf.mxu1  ;;  %v1808_v14 = vsel %vm1792_vm8, %v1775_v38, %v1402_v61 }
 0x299   : > { %2208 = vst.msk [vmem:[%s3884_s8 + $0x98] sm:$0xff] %vm176_vm0, %v2398_v52 }
 0x29a   : > { %v2120_v7 = vpop.f32.mrf.mxu1  ;;  %v1432_v20 = vpop.permute.xlu1 %1431 }
 0x29b   : > { %2207 = vst.msk [vmem:[%s3884_s8 + $0x90] sm:$0xff] %vm176_vm0, %v2120_v7  ;;  %v1528_v44 = vpop.permute.xlu0 %1527  ;;  %v1823_v19 = vsel %vm1792_vm8, %v1790_v60, %v1432_v20 }
 0x29c   : > { %v1840_v53 = vsel %vm1825_vm7, %v1807_v27, %v1528_v44 }
 0x29d   : > { %2390 = vmatprep.mubr.msk.f32.mxu0 %vm1863_vm9, %v1840_v53 }
 0x29e   : > { %v1434_v2 = vpop.permute.xlu1 %1433 }
 0x29f   : > { %v1530_v12 = vpop.permute.xlu0 %1529  ;;  %v1824_v50 = vsel %vm1792_vm8, %v1791_v6, %v1434_v2 }
 0x2a0   : > { %v1841_v42 = vsel %vm1825_vm7, %v1808_v14, %v1530_v12 }
 0x2a1   : > { %2391 = vmatmul.mubr.msk.f32.gmra.mxu0 %vm1863_vm9, %v1841_v42 }
 0x2a2   : > { %v1560_v23 = vpop.permute.xlu1 %1559 }
 0x2a3   : > { %v1856_v34 = vsel %vm1825_vm7, %v1823_v19, %v1560_v23 }
 0x2a4   : > { %2414 = vmatprep.mubr.msk.f32.mxu1 %vm1863_vm9, %v1856_v34 }
 0x2a6   : > { %v1562_v29 = vpop.permute.xlu1 %1561 }
 0x2a7   : > { %v1857_v3 = vsel %vm1825_vm7, %v1824_v50, %v1562_v29 }
 0x2a8   : > { %2415 = vmatmul.mubr.msk.f32.gmra.mxu1 %vm1863_vm9, %v1857_v3 }
 0x2b5   : > { %v2377_v24 = vpop.f32.mrf.mxu0 }
 0x2b6   : > { %2194 = vst.msk [vmem:[%s3884_s8 + $0x28] sm:$0xff] %vm176_vm0, %v2377_v24 }
 0x2b7   : > { %v2050_v58 = vpop.f32.mrf.mxu0 }
 0x2b8   : > { %2193 = vst.msk [vmem:[%s3884_s8 + $0x20] sm:$0xff] %vm176_vm0, %v2050_v58 }
 0x2bc   : > { %v2401_v10 = vpop.f32.mrf.mxu1 }
 0x2bd   : > { %2210 = vst.msk [vmem:[%s3884_s8 + $0xa8] sm:$0xff] %vm176_vm0, %v2401_v10 }
 0x2be   : > { %v2130_v41 = vpop.f32.mrf.mxu1 }
 0x2bf   : > { %2209 = vst.msk [vmem:[%s3884_s8 + $0xa0] sm:$0xff] %vm176_vm0, %v2130_v41 }
 0x2d9   : > { %v2380_v48 = vpop.f32.mrf.mxu0 }
 0x2da   : > { %2196 = vst.msk [vmem:[%s3884_s8 + $0x38] sm:$0xff] %vm176_vm0, %v2380_v48 }
 0x2db   : > { %v2060_v30 = vpop.f32.mrf.mxu0 }
 0x2dc   : > { %2195 = vst.msk [vmem:[%s3884_s8 + $0x30] sm:$0xff] %vm176_vm0, %v2060_v30 }
 0x2e0   : > { %v2404_v28 = vpop.f32.mrf.mxu1 }
 0x2e1   : > { %2212 = vst.msk [vmem:[%s3884_s8 + $0xb8] sm:$0xff] %vm176_vm0, %v2404_v28 }
 0x2e2   : > { %v2140_v49 = vpop.f32.mrf.mxu1 }
 0x2e3   : > { %2211 = vst.msk [vmem:[%s3884_s8 + $0xb0] sm:$0xff] %vm176_vm0, %v2140_v49 }
 0x2fd   : > { %v2383_v21 = vpop.f32.mrf.mxu0 }
 0x2fe   : > { %2198 = vst.msk [vmem:[%s3884_s8 + $0x48] sm:$0xff] %vm176_vm0, %v2383_v21 }
 0x2ff   : > { %v2070_v32 = vpop.f32.mrf.mxu0 }
 0x300   : > { %2197 = vst.msk [vmem:[%s3884_s8 + $0x40] sm:$0xff] %vm176_vm0, %v2070_v32 }
 0x304   : > { %v2407_v56 = vpop.f32.mrf.mxu1 }
 0x305   : > { %2214 = vst.msk [vmem:[%s3884_s8 + $0xc8] sm:$0xff] %vm176_vm0, %v2407_v56 }
 0x306   : > { %v2150_v39 = vpop.f32.mrf.mxu1 }
 0x307   : > { %2213 = vst.msk [vmem:[%s3884_s8 + $0xc0] sm:$0xff] %vm176_vm0, %v2150_v39 }
 0x321   : > { %v2386_v61 = vpop.f32.mrf.mxu0 }
 0x322   : > { %2200 = vst.msk [vmem:[%s3884_s8 + $0x58] sm:$0xff] %vm176_vm0, %v2386_v61 }
 0x323   : > { %v2080_v52 = vpop.f32.mrf.mxu0 }
 0x324   : > { %2199 = vst.msk [vmem:[%s3884_s8 + $0x50] sm:$0xff] %vm176_vm0, %v2080_v52 }
 0x328   : > { %v2410_v55 = vpop.f32.mrf.mxu1 }
 0x329   : > { %2216 = vst.msk [vmem:[%s3884_s8 + $0xd8] sm:$0xff] %vm176_vm0, %v2410_v55 }
 0x32a   : > { %v2160_v43 = vpop.f32.mrf.mxu1 }
 0x32b   : > { %2215 = vst.msk [vmem:[%s3884_s8 + $0xd0] sm:$0xff] %vm176_vm0, %v2160_v43 }
 0x345   : > { %v2389_v51 = vpop.f32.mrf.mxu0 }
 0x346   : > { %2202 = vst.msk [vmem:[%s3884_s8 + $0x68] sm:$0xff] %vm176_vm0, %v2389_v51 }
 0x347   : > { %v2090_v22 = vpop.f32.mrf.mxu0 }
 0x348   : > { %2201 = vst.msk [vmem:[%s3884_s8 + $0x60] sm:$0xff] %vm176_vm0, %v2090_v22 }
 0x34c   : > { %v2413_v4 = vpop.f32.mrf.mxu1 }
 0x34d   : > { %2218 = vst.msk [vmem:[%s3884_s8 + $0xe8] sm:$0xff] %vm176_vm0, %v2413_v4 }
 0x34e   : > { %v2170_v63 = vpop.f32.mrf.mxu1 }
 0x34f   : > { %2217 = vst.msk [vmem:[%s3884_s8 + $0xe0] sm:$0xff] %vm176_vm0, %v2170_v63 }
 0x361   : > { %v2392_v7 = vpop.f32.mrf.mxu0 }
 0x362   : > { %2204 = vst.msk [vmem:[%s3884_s8 + $0x78] sm:$0xff] %vm176_vm0, %v2392_v7 }
 0x363   : > { %v2100_v20 = vpop.f32.mrf.mxu0 }
 0x364   : > { %2203 = vst.msk [vmem:[%s3884_s8 + $0x70] sm:$0xff] %vm176_vm0, %v2100_v20 }
 0x368   : > { %v2416_v1 = vpop.f32.mrf.mxu1 }
 0x369   : > { %2220 = vst.msk [vmem:[%s3884_s8 + $0xf8] sm:$0xff] %vm176_vm0, %v2416_v1 }
 0x36a   : > { %v2180_v57 = vpop.f32.mrf.mxu1 }
 0x36b   : > { %2219 = vst.msk [vmem:[%s3884_s8 + $0xf0] sm:$0xff] %vm176_vm0, %v2180_v57 }
 0x36c PF: > { %s12_s9 = sadd.s32 1, %s2470_s9  }
 0x36d   : > { %p9_p4 = scmp.ge.s32.totalorder %s12_s9, 4  }
 0x36f   :  { %11 = sbr.rel (!%p9_p4) target bundleno = 1 (0x1), region = 60 }

</bundles_post_ra>
